<compile_context>
chip_gen: v5e
topology: v5e:2x2
jax: 0.10.0
libtpu: 0.0.40
codegen_flags: <defaults>
</compile_context>

<pallas_src>
import functools
import math

import jax
import jax.numpy as jnp
import numpy as np
from jax import lax
from jax.experimental import pallas as pl
from jax.experimental.pallas import tpu as pltpu

# ----------------------------- toy BERT config ------------------------------
B = 2                 # batch
S = 8                 # sequence length
H = 32                # hidden_size
NH = 4                # num_attention_heads
D = H // NH           # attention_head_size
FFN = 4 * H           # intermediate_size (=128 -> lane-dense FFN matmuls)
L = 4                 # num_hidden_layers
VOCAB = 64            # vocab_size (toy)
MAXPOS = 32           # max_position_embeddings
TYPES = 2             # type_vocab_size
LN_EPS = 1e-12        # BertLayerNorm eps
_NEG_BIG = -1e9       # additive value that kills cross-(batch, head) score blocks

# MXU operand dtype.  Keep f32 at these toy shapes for tight numerics; set to
# jnp.bfloat16 on v6e/v7x at production BERT shapes (bf16-native MXU; f32
# accumulation is kept via preferred_element_type) and loosen test tolerances.
# All VPU/EUP math (softmax, GELU, LayerNorm) stays in f32 regardless (v5e).
MATMUL_DTYPE = jnp.float32
_HIGHEST = lax.Precision.HIGHEST


# ------------------------------- shared math ---------------------------------
def _layernorm(x, gamma, beta):
    mean = jnp.mean(x, axis=-1, keepdims=True)
    c = x - mean
    var = jnp.mean(c * c, axis=-1, keepdims=True)
    return c * lax.rsqrt(var + LN_EPS) * gamma + beta


def _embeddings(params, input_ids, position_ids):
    """BertEmbeddings (plain JAX): word + position + token_type, then LayerNorm."""
    we = jnp.take(params["word_emb"], input_ids, axis=0)
    pe = jnp.take(params["pos_emb"], position_ids, axis=0)
    te = jnp.take(params["type_emb"], jnp.zeros_like(input_ids), axis=0)
    # TODO(synk): embedding dropout omitted (identity in eval mode).
    return _layernorm(we + pe + te, params["emb_gamma"], params["emb_beta"])


def _gather_outputs(top_vec, clss, mask_clss, clst, mask_clst):
    """encoder_graph's final sentence/token gathers + mask multiplies."""
    b_idx = jnp.arange(top_vec.shape[0])[:, None]
    sents_vec = top_vec[b_idx, clss] * mask_clss[:, :, None].astype(jnp.float32)
    tokns_vec = top_vec[b_idx, clst] * mask_clst[:, :, None].astype(jnp.float32)
    return tokns_vec, sents_vec


# ------------------------------ Pallas kernel --------------------------------
def _bert_encoder_kernel(x_ref, maskf_ref,
                         wqkv_ref, bqkv_ref, wo_ref, bo_ref, g1_ref, b1_ref,
                         wi_ref, bi_ref, wo2_ref, bo2_ref, g2_ref, b2_ref,
                         out_ref, h_ref,
                         *, num_heads, head_size, batch, seq_len, hidden):
    """One grid step == one BertLayer.

    x_ref     : [B*S, H]            embeddings (consumed only at layer 0)
    maskf_ref : [NH*B*S, NH*B*S]    block-diagonal + key additive mask (shared)
    wqkv_ref  : [1, H, 3H]          fused Q/K/V weight for this layer ([in,out])
    bqkv_ref  : [1, 1, 3H]          fused Q/K/V bias
    wo_ref    : [1, H, H]  bo_ref: [1, 1, H]   attention output projection
    g1/b1     : [1, 1, H]           attention-output LayerNorm affine
    wi_ref    : [1, H, FFN] bi_ref: [1, 1, FFN]  intermediate (GELU) dense
    wo2_ref   : [1, FFN, H] bo2_ref:[1, 1, H]    FFN output dense
    g2/b2     : [1, 1, H]           FFN-output LayerNorm affine
    out_ref   : [B*S, H]            final encoder hidden states
    h_ref     : [B*S, H] f32 VMEM scratch carrying the hidden state across layers
    """
    layer_idx = pl.program_id(0)
    rows = batch * seq_len
    inv_sqrt_d = 1.0 / math.sqrt(head_size)

    @pl.when(layer_idx == 0)
    def _():
        h_ref[...] = x_ref[...].astype(jnp.float32)

    x = h_ref[...]                                                     # [rows, H]

    def mm(a, b):
        return jnp.dot(a.astype(MATMUL_DTYPE), b.astype(MATMUL_DTYPE),
                       preferred_element_type=jnp.float32, precision=_HIGHEST)

    # ---- BertSelfAttention: fused Q/K/V projection (one wide MXU push) ----
    qkv = mm(x, wqkv_ref[0]) + bqkv_ref[0]                             # [rows, 3H]
    q = qkv[:, 0 * hidden:1 * hidden]
    k = qkv[:, 1 * hidden:2 * hidden]
    v = qkv[:, 2 * hidden:3 * hidden]

    # Stack every (head, batch) attention block along sublanes: [NH*B*S, D].
    def stack_heads(t):
        return jnp.concatenate(
            [t[:, h * head_size:(h + 1) * head_size] for h in range(num_heads)],
            axis=0)

    qs, ks, vs = stack_heads(q), stack_heads(k), stack_heads(v)        # [NH*rows, D]

    # One MXU push covers every (b, h) score block; the precomputed additive
    # mask sends cross-block entries to -1e9 (exp underflows to exactly 0), so
    # a plain row softmax over the stacked width equals the per-head softmax.
    scores = lax.dot_general(qs.astype(MATMUL_DTYPE), ks.astype(MATMUL_DTYPE),
                             (((1,), (1,)), ((), ())),
                             preferred_element_type=jnp.float32,
                             precision=_HIGHEST)                       # [NH*rows, NH*rows]
    scores = scores * inv_sqrt_d + maskf_ref[...]

    m = jnp.max(scores, axis=-1, keepdims=True)
    e = jnp.exp(scores - m)
    denom = jnp.sum(e, axis=-1, keepdims=True)
    p = e * pl.reciprocal(denom, approx=True)                          # EUP vrcp
    # TODO(synk): attention-probs dropout omitted (identity in eval mode).

    ctx = mm(p, vs)                                                    # [NH*rows, D]
    # Back to [rows, H]: heads become lane-contiguous feature blocks.
    ctx2 = jnp.concatenate(
        [ctx[h * rows:(h + 1) * rows, :] for h in range(num_heads)], axis=-1)

    # ---- BertSelfOutput: single full-width projection + residual + LayerNorm
    attn = mm(ctx2, wo_ref[0]) + bo_ref[0]
    # TODO(synk): hidden-state dropout omitted (identity in eval mode).
    attn_ln = _layernorm(attn + x, g1_ref[0], b1_ref[0])

    # ---- BertIntermediate (GELU) + BertOutput (residual + LayerNorm) ----
    inter = jax.nn.gelu(mm(attn_ln, wi_ref[0]) + bi_ref[0], approximate=True)
    ffn = mm(inter, wo2_ref[0]) + bo2_ref[0]
    h_new = _layernorm(ffn + attn_ln, g2_ref[0], b2_ref[0])

    h_ref[...] = h_new                       # carry to the next layer/grid step
    out_ref[...] = h_new.astype(out_ref.dtype)


# ------------------------------- wrapper --------------------------------------
def _stack_layers(layers):
    """Stack per-layer params into [L, ...] tensors; fuse Q/K/V ([in,out])."""
    def stk(fn):
        return jnp.stack([fn(lp) for lp in layers], axis=0)
    return (
        stk(lambda lp: jnp.concatenate([lp["wq"], lp["wk"], lp["wv"]], axis=1)),  # [L,H,3H]
        stk(lambda lp: jnp.concatenate([lp["bq"], lp["bk"], lp["bv"]], axis=1)),  # [L,1,3H]
        stk(lambda lp: lp["wo"]), stk(lambda lp: lp["bo"]),
        stk(lambda lp: lp["g1"]), stk(lambda lp: lp["b1"]),
        stk(lambda lp: lp["wi"]), stk(lambda lp: lp["bi"]),
        stk(lambda lp: lp["wo2"]), stk(lambda lp: lp["bo2"]),
        stk(lambda lp: lp["g2"]), stk(lambda lp: lp["b2"]),
    )


def bert_encoder_pallas(hidden0, attention_mask, layers):
    """Run the full L-layer BertEncoder in a single pallas_call.

    hidden0        : [B, S, H] f32 embeddings output
    attention_mask : [B, S]    f32 (1 = attend, 0 = masked)
    """
    bsz, s, hdim = hidden0.shape
    nh, d, ffn = NH, D, FFN
    nlayer = len(layers)
    rows = bsz * s
    bns = nh * bsz * s

    # BERT extended additive mask semantics: 0 for attended, -10000 for masked.
    ext = (1.0 - attention_mask.astype(jnp.float32)) * -10000.0        # [B, S]

    # Stacked-layout combined mask (layout plumbing, built once, reused L times):
    # row/col index r = h*(B*S) + b*S + pos  ->  block = r // S = h*B + b.
    idx = jnp.arange(bns)
    col_b = (idx // s) % bsz
    col_k = idx % s
    key_mask = ext[col_b, col_k]                                       # [BNS]
    blk = idx // s
    mask_full = (jnp.where(blk[:, None] == blk[None, :], 0.0, _NEG_BIG)
                 + key_mask[None, :]).astype(jnp.float32)              # [BNS, BNS]

    stacks = _stack_layers(layers)

    kern = functools.partial(_bert_encoder_kernel, num_heads=nh, head_size=d,
                             batch=bsz, seq_len=s, hidden=hdim)

    def wspec(r, c):  # per-layer stacked weight: block index follows the layer axis
        return pl.BlockSpec((1, r, c), lambda l: (l, 0, 0))

    out = pl.pallas_call(
        kern,
        out_shape=jax.ShapeDtypeStruct((rows, hdim), jnp.float32),
        grid_spec=pltpu.PrefetchScalarGridSpec(
            num_scalar_prefetch=0,
            grid=(nlayer,),
            in_specs=[
                pl.BlockSpec((rows, hdim), lambda l: (0, 0)),   # embeddings
                pl.BlockSpec((bns, bns), lambda l: (0, 0)),     # stacked additive mask
                wspec(hdim, 3 * hdim),    # W_qkv
                wspec(1, 3 * hdim),       # b_qkv
                wspec(hdim, hdim),        # W_o
                wspec(1, hdim),           # b_o
                wspec(1, hdim),           # gamma1
                wspec(1, hdim),           # beta1
                wspec(hdim, ffn),         # W_intermediate
                wspec(1, ffn),            # b_intermediate
                wspec(ffn, hdim),         # W_output
                wspec(1, hdim),           # b_output
                wspec(1, hdim),           # gamma2
                wspec(1, hdim),           # beta2
            ],
            out_specs=pl.BlockSpec((rows, hdim), lambda l: (0, 0)),
            scratch_shapes=[pltpu.VMEM((rows, hdim), jnp.float32)],
        ),
        compiler_params=pltpu.CompilerParams(dimension_semantics=("arbitrary",)),
    )(hidden0.reshape(rows, hdim), mask_full, *stacks)

    return out.reshape(bsz, s, hdim)


def encoder_graph_forward(params, input_ids, position_ids, attention_mask,
                          clss, mask_clss, clst, mask_clst):
    """Full encoder_graph forward (dropouts = identity, pooler skipped)."""
    emb = _embeddings(params, input_ids, position_ids)                  # [B,S,H]
    top_vec = bert_encoder_pallas(emb, attention_mask, params["layers"])
    tokns_vec, sents_vec = _gather_outputs(top_vec, clss, mask_clss, clst, mask_clst)
    return tokns_vec, sents_vec, top_vec


# ------------------------------ pure-JAX reference ----------------------------
def reference_forward(params, input_ids, position_ids, attention_mask,
                      clss, mask_clss, clst, mask_clst):
    h = _embeddings(params, input_ids, position_ids)
    ext = ((1.0 - attention_mask.astype(jnp.float32)) * -10000.0)[:, None, None, :]
    bsz, s, hdim = h.shape

    for lp in params["layers"]:
        q = jnp.dot(h, lp["wq"], precision=_HIGHEST) + lp["bq"]
        k = jnp.dot(h, lp["wk"], precision=_HIGHEST) + lp["bk"]
        v = jnp.dot(h, lp["wv"], precision=_HIGHEST) + lp["bv"]

        def split(t):
            return t.reshape(bsz, s, NH, D).transpose(0, 2, 1, 3)

        qh, kh, vh = split(q), split(k), split(v)
        scores = jnp.einsum("bhqd,bhkd->bhqk", qh, kh,
                            precision=_HIGHEST) / math.sqrt(D) + ext
        probs = jax.nn.softmax(scores, axis=-1)
        ctx = jnp.einsum("bhqk,bhkd->bhqd", probs, vh, precision=_HIGHEST)
        ctx = ctx.transpose(0, 2, 1, 3).reshape(bsz, s, hdim)

        attn = jnp.dot(ctx, lp["wo"], precision=_HIGHEST) + lp["bo"]
        attn_ln = _layernorm(attn + h, lp["g1"], lp["b1"])

        inter = jax.nn.gelu(jnp.dot(attn_ln, lp["wi"], precision=_HIGHEST) + lp["bi"],
                            approximate=True)
        ffn = jnp.dot(inter, lp["wo2"], precision=_HIGHEST) + lp["bo2"]
        h = _layernorm(ffn + attn_ln, lp["g2"], lp["b2"])

    top_vec = h
    tokns_vec, sents_vec = _gather_outputs(top_vec, clss, mask_clss, clst, mask_clst)
    return tokns_vec, sents_vec, top_vec


# --------------------------------- params -------------------------------------
def make_params(key):
    """Random toy BERT params.  All Linear weights stored as [in, out]."""
    std = 0.02
    k_emb, k_layers = jax.random.split(key)
    ke = jax.random.split(k_emb, 3)

    def dense(k, shape):
        return jax.random.normal(k, shape, jnp.float32) * std

    params = {
        "word_emb": dense(ke[0], (VOCAB, H)),
        "pos_emb": dense(ke[1], (MAXPOS, H)),
        "type_emb": dense(ke[2], (TYPES, H)),
        "emb_gamma": jnp.ones((1, H), jnp.float32),
        "emb_beta": jnp.zeros((1, H), jnp.float32),
        "layers": [],
    }
    for lk in jax.random.split(k_layers, L):
        k = jax.random.split(lk, 12)
        params["layers"].append({
            "wq": dense(k[0], (H, H)),   "bq": dense(k[1], (1, H)),
            "wk": dense(k[2], (H, H)),   "bk": dense(k[3], (1, H)),
            "wv": dense(k[4], (H, H)),   "bv": dense(k[5], (1, H)),
            "wo": dense(k[6], (H, H)),   "bo": dense(k[7], (1, H)),
            "g1": jnp.ones((1, H), jnp.float32), "b1": jnp.zeros((1, H), jnp.float32),
            "wi": dense(k[8], (H, FFN)),   "bi": dense(k[9], (1, FFN)),
            "wo2": dense(k[10], (FFN, H)), "bo2": dense(k[11], (1, H)),
            "g2": jnp.ones((1, H), jnp.float32), "b2": jnp.zeros((1, H), jnp.float32),
        })
    return params


# ----------------------------------- main --------------------------------------
if __name__ == "__main__":
    key = jax.random.PRNGKey(0)
    k_ids, k_mask, k_clss, k_clst, k_mcs, k_mct, k_par = jax.random.split(key, 7)

    input_ids = jax.random.randint(k_ids, (B, S), 1, VOCAB, dtype=jnp.int32)
    position_ids = jnp.broadcast_to(jnp.arange(S, dtype=jnp.int32), (B, S))
    attention_mask = (jax.random.uniform(k_mask, (B, S)) > 0.2).astype(jnp.float32)
    attention_mask = attention_mask.at[:, 0].set(1.0)        # keep [CLS] visible

    n_sent, n_tok = 2, 4
    clss = jax.random.randint(k_clss, (B, n_sent), 0, S, dtype=jnp.int32)
    clst = jax.random.randint(k_clst, (B, n_tok), 0, S, dtype=jnp.int32)
    mask_clss = (jax.random.uniform(k_mcs, (B, n_sent)) > 0.3).astype(jnp.float32)
    mask_clst = (jax.random.uniform(k_mct, (B, n_tok)) > 0.3).astype(jnp.float32)

    params = make_params(k_par)

    fwd = jax.jit(encoder_graph_forward)
    tokns_vec, sents_vec, top_vec = fwd(params, input_ids, position_ids,
                                        attention_mask, clss, mask_clss,
                                        clst, mask_clst)
    jax.block_until_ready((tokns_vec, sents_vec, top_vec))

    ref_tokns, ref_sents, ref_top = reference_forward(
        params, input_ids, position_ids, attention_mask,
        clss, mask_clss, clst, mask_clst)

    # Tolerances cover pl.reciprocal(approx=True) in the softmax plus MXU-vs-XLA
    # transcendental/rounding differences accumulated across L=4 fused layers.
    np.testing.assert_allclose(np.asarray(top_vec), np.asarray(ref_top),
                               atol=5e-4, rtol=5e-4)
    np.testing.assert_allclose(np.asarray(tokns_vec), np.asarray(ref_tokns),
                               atol=5e-4, rtol=5e-4)
    np.testing.assert_allclose(np.asarray(sents_vec), np.asarray(ref_sents),
                               atol=5e-4, rtol=5e-4)

    print("KERNEL_OK")
</pallas_src>

<mosaic_0001>
module attributes {stable_mosaic.version = 11 : i64} {
  func.func @_bert_encoder_kernel(%arg0: i32, %arg1: memref<16x32xf32, #tpu.memory_space<vmem>>, %arg2: memref<64x64xf32, #tpu.memory_space<vmem>>, %arg3: memref<1x32x96xf32, #tpu.memory_space<vmem>>, %arg4: memref<1x1x96xf32, #tpu.memory_space<vmem>>, %arg5: memref<1x32x32xf32, #tpu.memory_space<vmem>>, %arg6: memref<1x1x32xf32, #tpu.memory_space<vmem>>, %arg7: memref<1x1x32xf32, #tpu.memory_space<vmem>>, %arg8: memref<1x1x32xf32, #tpu.memory_space<vmem>>, %arg9: memref<1x32x128xf32, #tpu.memory_space<vmem>>, %arg10: memref<1x1x128xf32, #tpu.memory_space<vmem>>, %arg11: memref<1x128x32xf32, #tpu.memory_space<vmem>>, %arg12: memref<1x1x32xf32, #tpu.memory_space<vmem>>, %arg13: memref<1x1x32xf32, #tpu.memory_space<vmem>>, %arg14: memref<1x1x32xf32, #tpu.memory_space<vmem>>, %arg15: memref<16x32xf32, #tpu.memory_space<vmem>>, %arg16: memref<16x32xf32, #tpu.memory_space<vmem>>) attributes {dimension_semantics = [#tpu.dimension_semantics<arbitrary>], iteration_bounds = array<i64: 4>, scalar_prefetch = 0 : i64, scratch_operands = 1 : i64, tpu.core_type = #tpu.core_type<tc>, window_params = [{pipeline_mode = #tpu.pipeline_mode<synchronous>, transform_indices = @transform_0, window_bounds = array<i64: 16, 32>}, {pipeline_mode = #tpu.pipeline_mode<synchronous>, transform_indices = @transform_1, window_bounds = array<i64: 64, 64>}, {transform_indices = @transform_2, window_bounds = array<i64: 1, 32, 96>}, {transform_indices = @transform_3, window_bounds = array<i64: 1, 1, 96>}, {transform_indices = @transform_4, window_bounds = array<i64: 1, 32, 32>}, {transform_indices = @transform_5, window_bounds = array<i64: 1, 1, 32>}, {transform_indices = @transform_6, window_bounds = array<i64: 1, 1, 32>}, {transform_indices = @transform_7, window_bounds = array<i64: 1, 1, 32>}, {transform_indices = @transform_8, window_bounds = array<i64: 1, 32, 128>}, {transform_indices = @transform_9, window_bounds = array<i64: 1, 1, 128>}, {transform_indices = @transform_10, window_bounds = array<i64: 1, 128, 32>}, {transform_indices = @transform_11, window_bounds = array<i64: 1, 1, 32>}, {transform_indices = @transform_12, window_bounds = array<i64: 1, 1, 32>}, {transform_indices = @transform_13, window_bounds = array<i64: 1, 1, 32>}, {pipeline_mode = #tpu.pipeline_mode<synchronous>, transform_indices = @transform_14, window_bounds = array<i64: 16, 32>}]} {
    %c0_i32 = arith.constant 0 : i32
    %0 = arith.cmpi eq, %arg0, %c0_i32 : i32
    %1 = arith.extui %0 : i1 to i32
    %c0_i32_0 = arith.constant 0 : i32
    %2 = arith.cmpi ne, %1, %c0_i32_0 : i32
    scf.if %2 {
      %c0_66 = arith.constant 0 : index
      %c0_67 = arith.constant 0 : index
      %136 = vector.load %arg1[%c0_66, %c0_67] : memref<16x32xf32, #tpu.memory_space<vmem>>, vector<16x32xf32>
      %c0_68 = arith.constant 0 : index
      %c0_69 = arith.constant 0 : index
      %137 = vector.load %arg16[%c0_68, %c0_69] : memref<16x32xf32, #tpu.memory_space<vmem>>, vector<16x32xf32>
      tpu.vector_store %arg16[%c0_68, %c0_69], %136 {strides = array<i32>} : memref<16x32xf32, #tpu.memory_space<vmem>>, vector<16x32xf32>,
    } else {
    }
    %c0 = arith.constant 0 : index
    %c0_1 = arith.constant 0 : index
    %3 = vector.load %arg16[%c0, %c0_1] : memref<16x32xf32, #tpu.memory_space<vmem>>, vector<16x32xf32>
    %c0_2 = arith.constant 0 : index
    %c0_3 = arith.constant 0 : index
    %c0_4 = arith.constant 0 : index
    %4 = vector.load %arg3[%c0_2, %c0_3, %c0_4] : memref<1x32x96xf32, #tpu.memory_space<vmem>>, vector<1x32x96xf32>
    %5 = vector.shape_cast %4 : vector<1x32x96xf32> to vector<32x96xf32>
    %cst = arith.constant dense<0.000000e+00> : vector<16x96xf32>
    %6 = tpu.matmul %3, %5, %cst {dimension_numbers = #tpu.dot_dimension_numbers<[1], [0], [0], [1], [0, 0, 1, 1], [], []>, precision = #tpu.contract_precision<fp32>} : vector<16x32xf32>, vector<32x96xf32>, vector<16x96xf32> -> vector<16x96xf32>
    %c0_5 = arith.constant 0 : index
    %c0_6 = arith.constant 0 : index
    %c0_7 = arith.constant 0 : index
    %7 = vector.load %arg4[%c0_5, %c0_6, %c0_7] : memref<1x1x96xf32, #tpu.memory_space<vmem>>, vector<1x1x96xf32>
    %8 = vector.shape_cast %7 : vector<1x1x96xf32> to vector<1x96xf32>
    %9 = vector.broadcast %8 : vector<1x96xf32> to vector<16x96xf32>
    %10 = arith.addf %6, %9 : vector<16x96xf32>
    %11 = vector.extract_strided_slice %10 {offsets = [0, 0], sizes = [16, 32], strides = [1, 1]} : vector<16x96xf32> to vector<16x32xf32>
    %12 = vector.extract_strided_slice %10 {offsets = [0, 32], sizes = [16, 32], strides = [1, 1]} : vector<16x96xf32> to vector<16x32xf32>
    %13 = vector.extract_strided_slice %10 {offsets = [0, 64], sizes = [16, 32], strides = [1, 1]} : vector<16x96xf32> to vector<16x32xf32>
    %14 = vector.extract_strided_slice %11 {offsets = [0, 0], sizes = [16, 8], strides = [1, 1]} : vector<16x32xf32> to vector<16x8xf32>
    %15 = vector.extract_strided_slice %11 {offsets = [0, 8], sizes = [16, 8], strides = [1, 1]} : vector<16x32xf32> to vector<16x8xf32>
    %16 = vector.extract_strided_slice %11 {offsets = [0, 16], sizes = [16, 8], strides = [1, 1]} : vector<16x32xf32> to vector<16x8xf32>
    %17 = vector.extract_strided_slice %11 {offsets = [0, 24], sizes = [16, 8], strides = [1, 1]} : vector<16x32xf32> to vector<16x8xf32>
    %18 = tpu.concatenate %14, %15, %16, %17 in 0 : vector<16x8xf32>, vector<16x8xf32>, vector<16x8xf32>, vector<16x8xf32> -> vector<64x8xf32>
    %19 = vector.extract_strided_slice %12 {offsets = [0, 0], sizes = [16, 8], strides = [1, 1]} : vector<16x32xf32> to vector<16x8xf32>
    %20 = vector.extract_strided_slice %12 {offsets = [0, 8], sizes = [16, 8], strides = [1, 1]} : vector<16x32xf32> to vector<16x8xf32>
    %21 = vector.extract_strided_slice %12 {offsets = [0, 16], sizes = [16, 8], strides = [1, 1]} : vector<16x32xf32> to vector<16x8xf32>
    %22 = vector.extract_strided_slice %12 {offsets = [0, 24], sizes = [16, 8], strides = [1, 1]} : vector<16x32xf32> to vector<16x8xf32>
    %23 = tpu.concatenate %19, %20, %21, %22 in 0 : vector<16x8xf32>, vector<16x8xf32>, vector<16x8xf32>, vector<16x8xf32> -> vector<64x8xf32>
    %24 = vector.extract_strided_slice %13 {offsets = [0, 0], sizes = [16, 8], strides = [1, 1]} : vector<16x32xf32> to vector<16x8xf32>
    %25 = vector.extract_strided_slice %13 {offsets = [0, 8], sizes = [16, 8], strides = [1, 1]} : vector<16x32xf32> to vector<16x8xf32>
    %26 = vector.extract_strided_slice %13 {offsets = [0, 16], sizes = [16, 8], strides = [1, 1]} : vector<16x32xf32> to vector<16x8xf32>
    %27 = vector.extract_strided_slice %13 {offsets = [0, 24], sizes = [16, 8], strides = [1, 1]} : vector<16x32xf32> to vector<16x8xf32>
    %28 = tpu.concatenate %24, %25, %26, %27 in 0 : vector<16x8xf32>, vector<16x8xf32>, vector<16x8xf32>, vector<16x8xf32> -> vector<64x8xf32>
    %cst_8 = arith.constant dense<0.000000e+00> : vector<64x64xf32>
    %29 = tpu.matmul %18, %23, %cst_8 {dimension_numbers = #tpu.dot_dimension_numbers<[1], [1], [0], [0], [0, 0, 1, 0], [], []>, precision = #tpu.contract_precision<fp32>} : vector<64x8xf32>, vector<64x8xf32>, vector<64x64xf32> -> vector<64x64xf32>
    %cst_9 = arith.constant 0.353553385 : f32
    %30 = vector.broadcast %cst_9 : f32 to vector<64x64xf32>
    %31 = arith.mulf %29, %30 : vector<64x64xf32>
    %c0_10 = arith.constant 0 : index
    %c0_11 = arith.constant 0 : index
    %32 = vector.load %arg2[%c0_10, %c0_11] : memref<64x64xf32, #tpu.memory_space<vmem>>, vector<64x64xf32>
    %33 = arith.addf %31, %32 : vector<64x64xf32>
    %cst_12 = arith.constant dense<0xFF800000> : vector<64xf32>
    %34 = vector.multi_reduction <maximumf>, %33, %cst_12 [1] : vector<64x64xf32> to vector<64xf32>
    %35 = vector.shape_cast %34 : vector<64xf32> to vector<64x1xf32>
    %36 = vector.broadcast %35 : vector<64x1xf32> to vector<64x64xf32>
    %37 = arith.subf %33, %36 : vector<64x64xf32>
    %38 = math.exp %37 : vector<64x64xf32>
    %cst_13 = arith.constant dense<0.000000e+00> : vector<64xf32>
    %39 = vector.multi_reduction <add>, %38, %cst_13 [1] : vector<64x64xf32> to vector<64xf32>
    %40 = vector.shape_cast %39 : vector<64xf32> to vector<64x1xf32>
    %41 = tpu.reciprocal %40 {approx = true} : vector<64x1xf32> -> vector<64x1xf32>
    %42 = vector.broadcast %41 : vector<64x1xf32> to vector<64x64xf32>
    %43 = arith.mulf %38, %42 : vector<64x64xf32>
    %cst_14 = arith.constant dense<0.000000e+00> : vector<64x8xf32>
    %44 = tpu.matmul %43, %28, %cst_14 {dimension_numbers = #tpu.dot_dimension_numbers<[1], [0], [0], [1], [0, 0, 1, 1], [], []>, precision = #tpu.contract_precision<fp32>} : vector<64x64xf32>, vector<64x8xf32>, vector<64x8xf32> -> vector<64x8xf32>
    %45 = vector.extract_strided_slice %44 {offsets = [0, 0], sizes = [16, 8], strides = [1, 1]} : vector<64x8xf32> to vector<16x8xf32>
    %46 = vector.extract_strided_slice %44 {offsets = [16, 0], sizes = [16, 8], strides = [1, 1]} : vector<64x8xf32> to vector<16x8xf32>
    %47 = vector.extract_strided_slice %44 {offsets = [32, 0], sizes = [16, 8], strides = [1, 1]} : vector<64x8xf32> to vector<16x8xf32>
    %48 = vector.extract_strided_slice %44 {offsets = [48, 0], sizes = [16, 8], strides = [1, 1]} : vector<64x8xf32> to vector<16x8xf32>
    %49 = tpu.concatenate %45, %46, %47, %48 in 1 : vector<16x8xf32>, vector<16x8xf32>, vector<16x8xf32>, vector<16x8xf32> -> vector<16x32xf32>
    %c0_15 = arith.constant 0 : index
    %c0_16 = arith.constant 0 : index
    %c0_17 = arith.constant 0 : index
    %50 = vector.load %arg5[%c0_15, %c0_16, %c0_17] : memref<1x32x32xf32, #tpu.memory_space<vmem>>, vector<1x32x32xf32>
    %51 = vector.shape_cast %50 : vector<1x32x32xf32> to vector<32x32xf32>
    %cst_18 = arith.constant dense<0.000000e+00> : vector<16x32xf32>
    %52 = tpu.matmul %49, %51, %cst_18 {dimension_numbers = #tpu.dot_dimension_numbers<[1], [0], [0], [1], [0, 0, 1, 1], [], []>, precision = #tpu.contract_precision<fp32>} : vector<16x32xf32>, vector<32x32xf32>, vector<16x32xf32> -> vector<16x32xf32>
    %c0_19 = arith.constant 0 : index
    %c0_20 = arith.constant 0 : index
    %c0_21 = arith.constant 0 : index
    %53 = vector.load %arg6[%c0_19, %c0_20, %c0_21] : memref<1x1x32xf32, #tpu.memory_space<vmem>>, vector<1x1x32xf32>
    %54 = vector.shape_cast %53 : vector<1x1x32xf32> to vector<1x32xf32>
    %55 = vector.broadcast %54 : vector<1x32xf32> to vector<16x32xf32>
    %56 = arith.addf %52, %55 : vector<16x32xf32>
    %57 = arith.addf %56, %3 : vector<16x32xf32>
    %c0_22 = arith.constant 0 : index
    %c0_23 = arith.constant 0 : index
    %c0_24 = arith.constant 0 : index
    %58 = vector.load %arg7[%c0_22, %c0_23, %c0_24] : memref<1x1x32xf32, #tpu.memory_space<vmem>>, vector<1x1x32xf32>
    %59 = vector.shape_cast %58 : vector<1x1x32xf32> to vector<1x32xf32>
    %c0_25 = arith.constant 0 : index
    %c0_26 = arith.constant 0 : index
    %c0_27 = arith.constant 0 : index
    %60 = vector.load %arg8[%c0_25, %c0_26, %c0_27] : memref<1x1x32xf32, #tpu.memory_space<vmem>>, vector<1x1x32xf32>
    %61 = vector.shape_cast %60 : vector<1x1x32xf32> to vector<1x32xf32>
    %cst_28 = arith.constant dense<0.000000e+00> : vector<16xf32>
    %62 = vector.multi_reduction <add>, %57, %cst_28 [1] : vector<16x32xf32> to vector<16xf32>
    %63 = vector.shape_cast %62 : vector<16xf32> to vector<16x1xf32>
    %cst_29 = arith.constant 3.200000e+01 : f32
    %64 = vector.broadcast %cst_29 : f32 to vector<16x1xf32>
    %65 = arith.divf %63, %64 : vector<16x1xf32>
    %66 = vector.broadcast %65 : vector<16x1xf32> to vector<16x32xf32>
    %67 = arith.subf %57, %66 : vector<16x32xf32>
    %68 = arith.mulf %67, %67 : vector<16x32xf32>
    %cst_30 = arith.constant dense<0.000000e+00> : vector<16xf32>
    %69 = vector.multi_reduction <add>, %68, %cst_30 [1] : vector<16x32xf32> to vector<16xf32>
    %70 = vector.shape_cast %69 : vector<16xf32> to vector<16x1xf32>
    %cst_31 = arith.constant 3.200000e+01 : f32
    %71 = vector.broadcast %cst_31 : f32 to vector<16x1xf32>
    %72 = arith.divf %70, %71 : vector<16x1xf32>
    %cst_32 = arith.constant 9.99999996E-13 : f32
    %73 = vector.broadcast %cst_32 : f32 to vector<16x1xf32>
    %74 = arith.addf %72, %73 : vector<16x1xf32>
    %75 = math.rsqrt %74 : vector<16x1xf32>
    %76 = vector.broadcast %75 : vector<16x1xf32> to vector<16x32xf32>
    %77 = arith.mulf %67, %76 : vector<16x32xf32>
    %78 = vector.broadcast %59 : vector<1x32xf32> to vector<16x32xf32>
    %79 = arith.mulf %77, %78 : vector<16x32xf32>
    %80 = vector.broadcast %61 : vector<1x32xf32> to vector<16x32xf32>
    %81 = arith.addf %79, %80 : vector<16x32xf32>
    %c0_33 = arith.constant 0 : index
    %c0_34 = arith.constant 0 : index
    %c0_35 = arith.constant 0 : index
    %82 = vector.load %arg9[%c0_33, %c0_34, %c0_35] : memref<1x32x128xf32, #tpu.memory_space<vmem>>, vector<1x32x128xf32>
    %83 = vector.shape_cast %82 : vector<1x32x128xf32> to vector<32x128xf32>
    %cst_36 = arith.constant dense<0.000000e+00> : vector<16x128xf32>
    %84 = tpu.matmul %81, %83, %cst_36 {dimension_numbers = #tpu.dot_dimension_numbers<[1], [0], [0], [1], [0, 0, 1, 1], [], []>, precision = #tpu.contract_precision<fp32>} : vector<16x32xf32>, vector<32x128xf32>, vector<16x128xf32> -> vector<16x128xf32>
    %c0_37 = arith.constant 0 : index
    %c0_38 = arith.constant 0 : index
    %c0_39 = arith.constant 0 : index
    %85 = vector.load %arg10[%c0_37, %c0_38, %c0_39] : memref<1x1x128xf32, #tpu.memory_space<vmem>>, vector<1x1x128xf32>
    %86 = vector.shape_cast %85 : vector<1x1x128xf32> to vector<1x128xf32>
    %87 = vector.broadcast %86 : vector<1x128xf32> to vector<16x128xf32>
    %88 = arith.addf %84, %87 : vector<16x128xf32>
    %89 = arith.mulf %88, %88 : vector<16x128xf32>
    %90 = arith.mulf %88, %89 : vector<16x128xf32>
    %cst_40 = arith.constant 4.471500e-02 : f32
    %91 = vector.broadcast %cst_40 : f32 to vector<16x128xf32>
    %92 = arith.mulf %91, %90 : vector<16x128xf32>
    %93 = arith.addf %88, %92 : vector<16x128xf32>
    %cst_41 = arith.constant 0.797884583 : f32
    %94 = vector.broadcast %cst_41 : f32 to vector<16x128xf32>
    %95 = arith.mulf %94, %93 : vector<16x128xf32>
    %96 = math.tanh %95 : vector<16x128xf32>
    %cst_42 = arith.constant 1.000000e+00 : f32
    %97 = vector.broadcast %cst_42 : f32 to vector<16x128xf32>
    %98 = arith.addf %97, %96 : vector<16x128xf32>
    %cst_43 = arith.constant 5.000000e-01 : f32
    %99 = vector.broadcast %cst_43 : f32 to vector<16x128xf32>
    %100 = arith.mulf %99, %98 : vector<16x128xf32>
    %101 = arith.mulf %88, %100 : vector<16x128xf32>
    %c0_44 = arith.constant 0 : index
    %c0_45 = arith.constant 0 : index
    %c0_46 = arith.constant 0 : index
    %102 = vector.load %arg11[%c0_44, %c0_45, %c0_46] : memref<1x128x32xf32, #tpu.memory_space<vmem>>, vector<1x128x32xf32>
    %103 = vector.shape_cast %102 : vector<1x128x32xf32> to vector<128x32xf32>
    %cst_47 = arith.constant dense<0.000000e+00> : vector<16x32xf32>
    %104 = tpu.matmul %101, %103, %cst_47 {dimension_numbers = #tpu.dot_dimension_numbers<[1], [0], [0], [1], [0, 0, 1, 1], [], []>, precision = #tpu.contract_precision<fp32>} : vector<16x128xf32>, vector<128x32xf32>, vector<16x32xf32> -> vector<16x32xf32>
    %c0_48 = arith.constant 0 : index
    %c0_49 = arith.constant 0 : index
    %c0_50 = arith.constant 0 : index
    %105 = vector.load %arg12[%c0_48, %c0_49, %c0_50] : memref<1x1x32xf32, #tpu.memory_space<vmem>>, vector<1x1x32xf32>
    %106 = vector.shape_cast %105 : vector<1x1x32xf32> to vector<1x32xf32>
    %107 = vector.broadcast %106 : vector<1x32xf32> to vector<16x32xf32>
    %108 = arith.addf %104, %107 : vector<16x32xf32>
    %109 = arith.addf %108, %81 : vector<16x32xf32>
    %c0_51 = arith.constant 0 : index
    %c0_52 = arith.constant 0 : index
    %c0_53 = arith.constant 0 : index
    %110 = vector.load %arg13[%c0_51, %c0_52, %c0_53] : memref<1x1x32xf32, #tpu.memory_space<vmem>>, vector<1x1x32xf32>
    %111 = vector.shape_cast %110 : vector<1x1x32xf32> to vector<1x32xf32>
    %c0_54 = arith.constant 0 : index
    %c0_55 = arith.constant 0 : index
    %c0_56 = arith.constant 0 : index
    %112 = vector.load %arg14[%c0_54, %c0_55, %c0_56] : memref<1x1x32xf32, #tpu.memory_space<vmem>>, vector<1x1x32xf32>
    %113 = vector.shape_cast %112 : vector<1x1x32xf32> to vector<1x32xf32>
    %cst_57 = arith.constant dense<0.000000e+00> : vector<16xf32>
    %114 = vector.multi_reduction <add>, %109, %cst_57 [1] : vector<16x32xf32> to vector<16xf32>
    %115 = vector.shape_cast %114 : vector<16xf32> to vector<16x1xf32>
    %cst_58 = arith.constant 3.200000e+01 : f32
    %116 = vector.broadcast %cst_58 : f32 to vector<16x1xf32>
    %117 = arith.divf %115, %116 : vector<16x1xf32>
    %118 = vector.broadcast %117 : vector<16x1xf32> to vector<16x32xf32>
    %119 = arith.subf %109, %118 : vector<16x32xf32>
    %120 = arith.mulf %119, %119 : vector<16x32xf32>
    %cst_59 = arith.constant dense<0.000000e+00> : vector<16xf32>
    %121 = vector.multi_reduction <add>, %120, %cst_59 [1] : vector<16x32xf32> to vector<16xf32>
    %122 = vector.shape_cast %121 : vector<16xf32> to vector<16x1xf32>
    %cst_60 = arith.constant 3.200000e+01 : f32
    %123 = vector.broadcast %cst_60 : f32 to vector<16x1xf32>
    %124 = arith.divf %122, %123 : vector<16x1xf32>
    %cst_61 = arith.constant 9.99999996E-13 : f32
    %125 = vector.broadcast %cst_61 : f32 to vector<16x1xf32>
    %126 = arith.addf %124, %125 : vector<16x1xf32>
    %127 = math.rsqrt %126 : vector<16x1xf32>
    %128 = vector.broadcast %127 : vector<16x1xf32> to vector<16x32xf32>
    %129 = arith.mulf %119, %128 : vector<16x32xf32>
    %130 = vector.broadcast %111 : vector<1x32xf32> to vector<16x32xf32>
    %131 = arith.mulf %129, %130 : vector<16x32xf32>
    %132 = vector.broadcast %113 : vector<1x32xf32> to vector<16x32xf32>
    %133 = arith.addf %131, %132 : vector<16x32xf32>
    %c0_62 = arith.constant 0 : index
    %c0_63 = arith.constant 0 : index
    %134 = vector.load %arg16[%c0_62, %c0_63] : memref<16x32xf32, #tpu.memory_space<vmem>>, vector<16x32xf32>
    tpu.vector_store %arg16[%c0_62, %c0_63], %133 {strides = array<i32>} : memref<16x32xf32, #tpu.memory_space<vmem>>, vector<16x32xf32>,
    %c0_64 = arith.constant 0 : index
    %c0_65 = arith.constant 0 : index
    %135 = vector.load %arg15[%c0_64, %c0_65] : memref<16x32xf32, #tpu.memory_space<vmem>>, vector<16x32xf32>
    tpu.vector_store %arg15[%c0_64, %c0_65], %133 {strides = array<i32>} : memref<16x32xf32, #tpu.memory_space<vmem>>, vector<16x32xf32>,
    return
  }
  func.func @transform_0(%arg0: i32) -> (i32, i32) {
    %c0_i32 = arith.constant 0 : i32
    %c0_i32_0 = arith.constant 0 : i32
    %c0_i32_1 = arith.constant 0 : i32
    return %c0_i32, %c0_i32_0 : i32, i32
  }
  func.func @transform_1(%arg0: i32) -> (i32, i32) {
    %c0_i32 = arith.constant 0 : i32
    %c0_i32_0 = arith.constant 0 : i32
    %c0_i32_1 = arith.constant 0 : i32
    return %c0_i32, %c0_i32_0 : i32, i32
  }
  func.func @transform_2(%arg0: i32) -> (i32, i32, i32) {
    %c0_i32 = arith.constant 0 : i32
    %c0_i32_0 = arith.constant 0 : i32
    %c0_i32_1 = arith.constant 0 : i32
    return %arg0, %c0_i32, %c0_i32_0 : i32, i32, i32
  }
  func.func @transform_3(%arg0: i32) -> (i32, i32, i32) {
    %c0_i32 = arith.constant 0 : i32
    %c0_i32_0 = arith.constant 0 : i32
    %c0_i32_1 = arith.constant 0 : i32
    return %arg0, %c0_i32, %c0_i32_0 : i32, i32, i32
  }
  func.func @transform_4(%arg0: i32) -> (i32, i32, i32) {
    %c0_i32 = arith.constant 0 : i32
    %c0_i32_0 = arith.constant 0 : i32
    %c0_i32_1 = arith.constant 0 : i32
    return %arg0, %c0_i32, %c0_i32_0 : i32, i32, i32
  }
  func.func @transform_5(%arg0: i32) -> (i32, i32, i32) {
    %c0_i32 = arith.constant 0 : i32
    %c0_i32_0 = arith.constant 0 : i32
    %c0_i32_1 = arith.constant 0 : i32
    return %arg0, %c0_i32, %c0_i32_0 : i32, i32, i32
  }
  func.func @transform_6(%arg0: i32) -> (i32, i32, i32) {
    %c0_i32 = arith.constant 0 : i32
    %c0_i32_0 = arith.constant 0 : i32
    %c0_i32_1 = arith.constant 0 : i32
    return %arg0, %c0_i32, %c0_i32_0 : i32, i32, i32
  }
  func.func @transform_7(%arg0: i32) -> (i32, i32, i32) {
    %c0_i32 = arith.constant 0 : i32
    %c0_i32_0 = arith.constant 0 : i32
    %c0_i32_1 = arith.constant 0 : i32
    return %arg0, %c0_i32, %c0_i32_0 : i32, i32, i32
  }
  func.func @transform_8(%arg0: i32) -> (i32, i32, i32) {
    %c0_i32 = arith.constant 0 : i32
    %c0_i32_0 = arith.constant 0 : i32
    %c0_i32_1 = arith.constant 0 : i32
    return %arg0, %c0_i32, %c0_i32_0 : i32, i32, i32
  }
  func.func @transform_9(%arg0: i32) -> (i32, i32, i32) {
    %c0_i32 = arith.constant 0 : i32
    %c0_i32_0 = arith.constant 0 : i32
    %c0_i32_1 = arith.constant 0 : i32
    return %arg0, %c0_i32, %c0_i32_0 : i32, i32, i32
  }
  func.func @transform_10(%arg0: i32) -> (i32, i32, i32) {
    %c0_i32 = arith.constant 0 : i32
    %c0_i32_0 = arith.constant 0 : i32
    %c0_i32_1 = arith.constant 0 : i32
    return %arg0, %c0_i32, %c0_i32_0 : i32, i32, i32
  }
  func.func @transform_11(%arg0: i32) -> (i32, i32, i32) {
    %c0_i32 = arith.constant 0 : i32
    %c0_i32_0 = arith.constant 0 : i32
    %c0_i32_1 = arith.constant 0 : i32
    return %arg0, %c0_i32, %c0_i32_0 : i32, i32, i32
  }
  func.func @transform_12(%arg0: i32) -> (i32, i32, i32) {
    %c0_i32 = arith.constant 0 : i32
    %c0_i32_0 = arith.constant 0 : i32
    %c0_i32_1 = arith.constant 0 : i32
    return %arg0, %c0_i32, %c0_i32_0 : i32, i32, i32
  }
  func.func @transform_13(%arg0: i32) -> (i32, i32, i32) {
    %c0_i32 = arith.constant 0 : i32
    %c0_i32_0 = arith.constant 0 : i32
    %c0_i32_1 = arith.constant 0 : i32
    return %arg0, %c0_i32, %c0_i32_0 : i32, i32, i32
  }
  func.func @transform_14(%arg0: i32) -> (i32, i32) {
    %c0_i32 = arith.constant 0 : i32
    %c0_i32_0 = arith.constant 0 : i32
    %c0_i32_1 = arith.constant 0 : i32
    return %c0_i32, %c0_i32_0 : i32, i32
  }
}

</mosaic_0001>

<bundles_post_ra>
// kernel: encoder_graph_forward.1
= control target key start
LH: loop header
LB: loop body
LE: loop exit
PB: predicated region body
PF: predicated region fallthrough
CT: control target
= control target key end

     0   :  { %s3356_s29 = smov 0   ;;  %s4250_s0 = inlined_call_operand.vmem [shape: f32[16,32], index: 0, kind: input, shape index: {}]   ;;  %s4251_s1 = inlined_call_operand.vmem [shape: f32[64,64], index: 1, kind: input, shape index: {}]   ;;  %s4252_s2 = inlined_call_operand.vmem [shape: f32[4,32,96], index: 2, kind: input, shape index: {}]   ;;  %s4253_s3 = inlined_call_operand.vmem [shape: f32[4,1,96], index: 3, kind: input, shape index: {}]   ;;  %s4254_s4 = inlined_call_operand.vmem [shape: f32[4,32,32], index: 4, kind: input, shape index: {}]   ;;  %s4255_s5 = inlined_call_operand.vmem [shape: f32[4,1,32], index: 5, kind: input, shape index: {}]   ;;  %s4256_s6 = inlined_call_operand.vmem [shape: f32[4,1,32], index: 6, kind: input, shape index: {}]   ;;  %s4257_s7 = inlined_call_operand.vmem [shape: f32[4,1,32], index: 7, kind: input, shape index: {}]   ;;  %s4258_s8 = inlined_call_operand.vmem [shape: f32[4,32,128], index: 8, kind: input, shape index: {}]   ;;  %s4259_s9 = inlined_call_operand.vmem [shape: f32[4,1,128], index: 9, kind: input, shape index: {}]   ;;  %s4260_s10 = inlined_call_operand.vmem [shape: f32[4,128,32], index: 10, kind: input, shape index: {}]   ;;  %s4261_s11 = inlined_call_operand.vmem [shape: f32[4,1,32], index: 11, kind: input, shape index: {}]   ;;  %s4262_s12 = inlined_call_operand.vmem [shape: f32[4,1,32], index: 12, kind: input, shape index: {}]   ;;  %s4263_s13 = inlined_call_operand.vmem [shape: f32[4,1,32], index: 13, kind: input, shape index: {}]   ;;  %s4264_s14 = inlined_call_operand.vmem [shape: f32[16,32], index: 14, kind: output, shape index: {}]  }
   0x1   :  { %4269 = sst [smem:[#allocation4_spill]] %s4250_s0 }
   0x2   :  { %4270 = sst [smem:[#allocation5_spill]] %s4251_s1 }
   0x3   :  { %4271 = sst [smem:[#allocation6_spill]] %s4252_s2 }
   0x4   :  { %4272 = sst [smem:[#allocation7_spill]] %s4254_s4 }
   0x5   :  { %4273 = sst [smem:[#allocation8_spill]] %s4264_s14 }
   0x6 LB: > { %4274 = sst [smem:[#allocation3_spill]] %s3270_s29  ;;  %s3164_s30 = sadd.s32 4294967295, %s3270_s29   ;;  %s3270_s29 = sphi %s3356_s29, %s24_s29  }
   0x7   : > { %p3167_p0 = scmp.ge.s32.totalorder %s3270_s29, 1  ;;  %p501_p1 = scmp.lt.s32.totalorder %s3270_s29, 5 }
   0x9   : > { %p502_p2 = pnand %p3167_p0, %p501_p1 }
   0xa   : > { %p581_p3 = scmp.lt.s32.totalorder (!%p502_p2), %s3164_s30, 3  ;;  %s4275_s2 = sld [smem:[#allocation6_spill]] (!%p502_p2) }
   0xb   : > { %505 = sbr.rel (%p502_p2) target bundleno = 2418 (0x972), region = 76  ;;  %s4276_s4 = sld [smem:[#allocation7_spill]] (!%p502_p2) }
   0xc   : > { %p3176_p4 = scmp.ne.s32.totalorder (!%p502_p2), %s3164_s30, 0 }
  0x10   : > { %s3364_s15 = scalar_select %p581_p3, %s3164_s30, 3 }
  0x12   : > { %s3179_s16 = sshll.u32 %s3364_s15, 5  ;;  %s618_s0 = scalar_lea.vmem %s4261_s11, %s3364_s15 }
  0x13   : > { %s585_s22 = scalar_lea.vmem %s4275_s2, %s3179_s16  ;;  %s3377_s25 = scalar_lea.vmem %s4276_s4, %s3179_s16 }
  0x14   : > { %s3394_s21 = scalar_lea.vmem %s4258_s8, %s3179_s16  ;;  %s3182_s4 = sshll.u32 %s3364_s15, 7 }
  0x15   : > { %s3404_s28 = scalar_lea.vmem %s4260_s10, %s3182_s4  ;;  %s621_s19 = scalar_lea.vmem %s4262_s12, %s3364_s15 }
  0x16   : > { %s624_s1 = scalar_lea.vmem %s4263_s13, %s3364_s15  ;;  %628 = sbr.rel (%p3176_p4) target bundleno = 32 (0x20), region = 80 }
  0x17   : > { %s4277_s2 = sld [smem:[#allocation4_spill]] (!%p3176_p4) }
  0x1b   : > { %vm631_vm0 = vcmask 261120  }
  0x1d   : > { %v629_v0 = vld [vmem:[%s4277_s2] sm:$0xff]  ;;  %v630_v1 = vld [vmem:[%s4277_s2 + $0x8] sm:$0xff] }
  0x1e   : > { %632 = vst.msk [vmem:[#allocation2] sm:$0xff] %vm631_vm0, %v629_v0 }
  0x1f   : > { %633 = vst.msk [vmem:[#allocation2 + $0x8] sm:$0xff] %vm631_vm0, %v630_v1 }
  0x20 PF: > { %v639_v2 = vld [vmem:[%s585_s22 + $0x18] sm:$0xff]  ;;  %v638_v3 = vld [vmem:[%s585_s22 + $0x10] sm:$0xff]  ;;  %v637_v4 = vld [vmem:[%s585_s22 + $0x8] sm:$0xff]  ;;  %vm644_vm1 = vcmask 261120   ;;  %s4278_s18 = scalar_lea.vmem %s4253_s3, %s3364_s15  ;;  %s3272_s27 = smov 120   ;;  %vm897_vm2 = vcmask 64512  }
  0x21   : > { %v663_v5 = vand.u32 4294901760, %v639_v2  ;;  %v665_v6 = vand.u32 4294901760, %v638_v3  ;;  %v667_v7 = vand.u32 4294901760, %v637_v4  ;;  %v636_v8 = vld [vmem:[%s585_s22] sm:$0xff]  ;;  %s3273_s14 = smov 112   ;;  %s3274_s29 = smov 104  }
  0x22   : > { %v669_v11 = vand.u32 4294901760, %v636_v8  ;;  %v3208_v44 = vld [vmem:[%s4278_s18] ss:$0 sm:$0xff]  ;;  %s3275_s17 = smov 96   ;;  %s4279_s23 = sld [smem:[#allocation5_spill]]  ;;  %vm1408_vm3 = vcmask 523264  }
  0x23   : > { %664 = vmatpush.msra.mxu0 %v663_v5  ;;  %v701_v14 = vsub.f32 %v639_v2, %v663_v5  ;;  %v707_v15 = vsub.f32 %v638_v3, %v665_v6  ;;  %781 = vmatpush.msra.mxu3 %v663_v5  ;;  %v713_v16 = vsub.f32 %v637_v4, %v667_v7  ;;  %s3277_s30 = smov 8   ;;  %s3278_s22 = smov 16   ;;  %vm2025_vm4 = vcmask 130048  }
  0x24   : > { %v719_v18 = vsub.f32 %v636_v8, %v669_v11  ;;  %s3279_s18 = smov 24   ;;  %vm2028_vm5 = vcmask 195584   ;;  %s4282_s24 = scalar_lea.vmem %s4257_s7, %s3364_s15 }
  0x25   : > { %v634_v9 = vld [vmem:[#allocation2] sm:$0xff]  ;;  %666 = vmatpush.msra.mxu0 %v665_v6  ;;  %747 = vmatpush.msra.mxu2 %v701_v14  ;;  %v702_v20 = vand.u32 4294901760, %v701_v14  ;;  %v708_v22 = vand.u32 4294901760, %v707_v15  ;;  %v714_v23 = vand.u32 4294901760, %v713_v16  ;;  %s4283_s26 = scalar_lea.vmem %s4259_s9, %s3364_s15 }
  0x26   : > { %v635_v10 = vld [vmem:[#allocation2 + $0x8] sm:$0xff]  ;;  %v646_v12 = vsel %vm644_vm1, %v634_v9, 0  ;;  %783 = vmatpush.msra.mxu3 %v665_v6  ;;  %v720_v24 = vand.u32 4294901760, %v719_v18 }
  0x27   : > { %v649_v13 = vsel %vm644_vm1, %v635_v10, 0  ;;  %v671_v17 = vand.u32 4294901760, %v646_v12  ;;  %668 = vmatpush.msra.mxu0 %v667_v7  ;;  %750 = vmatpush.msra.mxu2 %v707_v15  ;;  %v703_v26 = vsub.f32 %v701_v14, %v702_v20  ;;  %v709_v28 = vsub.f32 %v707_v15, %v708_v22 }
  0x28   : > { %v679_v19 = vand.u32 4294901760, %v649_v13  ;;  %v715_v29 = vsub.f32 %v713_v16, %v714_v23  ;;  %785 = vmatpush.msra.mxu3 %v667_v7  ;;  %v721_v30 = vsub.f32 %v719_v18, %v720_v24 }
  0x29   : > { %v672_v21 = vsub.f32 %v646_v12, %v671_v17  ;;  %670 = vmatpush.msra.mxu0 %v669_v11  ;;  %v704_v31 = vand.u32 4294901760, %v703_v26  ;;  %753 = vmatpush.msra.mxu2 %v713_v16  ;;  %v710_v33 = vand.u32 4294901760, %v709_v28 }
  0x2a   : > { %v680_v25 = vsub.f32 %v649_v13, %v679_v19  ;;  %787 = vmatpush.msra.mxu3 %v669_v11  ;;  %v716_v36 = vand.u32 4294901760, %v715_v29  ;;  %v722_v37 = vand.u32 4294901760, %v721_v30 }
  0x2b   : > { %v673_v27 = vand.u32 4294901760, %v672_v21  ;;  %816 = vmatpush.msrb.mxu0 %v702_v20  ;;  %705 = vmatpush.msra.mxu1 %v704_v31 }
  0x2c   : > { %v681_v34 = vand.u32 4294901760, %v680_v25  ;;  %756 = vmatpush.msra.mxu2 %v719_v18 }
  0x2d   : > { %v674_v32 = vsub.f32 %v672_v21, %v673_v27  ;;  %759 = vmatmul.f32.vlgmr.msra.gmra.mxu2 %v672_v21  ;;  %791 = vmatmul.f32.vlgmr.msra.gmra.mxu3 %v673_v27 }
  0x2e   : > { %711 = vmatpush.msra.mxu1 %v710_v33  ;;  %v682_v38 = vsub.f32 %v680_v25, %v681_v34  ;;  %820 = vmatpush.msrb.mxu0 %v708_v22 }
  0x2f   : > { %v675_v35 = vand.u32 4294901760, %v674_v32 }
  0x30   : > { %717 = vmatpush.msra.mxu1 %v716_v36  ;;  %824 = vmatpush.msrb.mxu0 %v714_v23  ;;  %v683_v39 = vand.u32 4294901760, %v682_v38 }
  0x31   : > { %676 = vmatmul.f32.vlgmr.msra.gmra.mxu0 %v675_v35 }
  0x32   : > { %723 = vmatpush.msra.mxu1 %v722_v37  ;;  %828 = vmatpush.msrb.mxu0 %v720_v24 }
  0x33   : > { %725 = vmatmul.f32.vlgmr.msra.gmra.mxu1 %v671_v17 }
  0x34   : > { %851 = vmatpush.msrb.mxu1 %v663_v5 }
  0x35   : > { %764 = vmatmul.f32.gmra.mxu2 %v680_v25  ;;  %797 = vmatmul.f32.gmra.mxu3 %v681_v34 }
  0x36   : > { %853 = vmatpush.msrb.mxu1 %v665_v6 }
  0x38   : > { %855 = vmatpush.msrb.mxu1 %v667_v7 }
  0x39   : > { %684 = vmatmul.f32.gmra.mxu0 %v683_v39 }
  0x3a   : > { %857 = vmatpush.msrb.mxu1 %v669_v11 }
  0x3b   : > { %729 = vmatmul.f32.gmra.mxu1 %v679_v19 }
  0x41   : > { %830 = vmatmul.f32.vlgmr.msrb.gmra.mxu0 %v671_v17 }
  0x43   : > { %859 = vmatmul.f32.vlgmr.msrb.gmra.mxu1 %v671_v17 }
  0x49   : > { %834 = vmatmul.f32.gmra.mxu0 %v679_v19 }
  0x4b   : > { %863 = vmatmul.f32.gmra.mxu1 %v679_v19 }
  0xae   : > { %v677_v40 = vpop.f32.mrf.mxu0 }
  0xaf   : > { %v678_v52 = vadd.f32 %v3208_v44, %v677_v40 }
  0xb0   : > { %v726_v41 = vpop.f32.mrf.mxu1  ;;  %v760_v43 = vpop.f32.mrf.mxu2 }
  0xb1   : > { %v792_v45 = vpop.f32.mrf.mxu3  ;;  %v727_v56 = vadd.f32 %v726_v41, %v678_v52 }
  0xb3   : > { %v761_v60 = vadd.f32 %v760_v43, %v727_v56 }
  0xb5   : > { %v793_v62 = vadd.f32 %v792_v45, %v761_v60 }
  0xb6   : > { %v685_v42 = vpop.f32.mrf.mxu0 }
  0xb7   : > { %v686_v47 = vadd.f32 %v3208_v44, %v685_v42 }
  0xb8   : > { %v730_v46 = vpop.f32.mrf.mxu1  ;;  %v765_v50 = vpop.f32.mrf.mxu2 }
  0xb9   : > { %v731_v49 = vadd.f32 %v730_v46, %v686_v47  ;;  %v798_v54 = vpop.f32.mrf.mxu3 }
  0xbb   : > { %v766_v53 = vadd.f32 %v765_v50, %v731_v49 }
  0xbd   : > { %v799_v57 = vadd.f32 %v798_v54, %v766_v53 }
  0xbe   : > { %v831_v48 = vpop.f32.mrf.mxu0 }
  0xbf   : > { %v832_v63 = vadd.f32 %v831_v48, %v793_v62 }
  0xc0   : > { %v860_v51 = vpop.f32.mrf.mxu1 }
  0xc1   : > { %v3436_v0 = vadd.f32 %v860_v51, %v832_v63 }
  0xc3   : > { %v898_v35 = vsel %vm897_vm2, %v3436_v0, 0 }
  0xc4   : > { %v3524_v43 = vand.u32 4294901760, %v898_v35 }
  0xc6   : > { %v835_v55 = vpop.f32.mrf.mxu0  ;;  %v955_v51 = vsub.f32 %v898_v35, %v3524_v43 }
  0xc7   : > { %v836_v58 = vadd.f32 %v835_v55, %v799_v57 }
  0xc8   : > { %v864_v59 = vpop.f32.mrf.mxu1  ;;  %v956_v57 = vand.u32 4294901760, %v955_v51 }
  0xc9   : > { %v3431_v61 = vadd.f32 %v864_v59, %v836_v58 }
  0xcb   : > { %871 = vrot.lane.b32.xlu2 %v3431_v61, %s3272_s27  ;;  %875 = vrot.lane.b32.xlu1 %v3431_v61, %s3273_s14  ;;  %v900_v52 = vsel %vm897_vm2, %v3431_v61, 0 }
  0xcc   : > { %879 = vrot.lane.b32.xlu0 %v3431_v61, %s3274_s29  ;;  %v3551_v58 = vand.u32 4294901760, %v900_v52 }
  0xd3   : > { %869 = vrot.lane.b32.xlu2 %v3436_v0, %s3272_s27  ;;  %873 = vrot.lane.b32.xlu1 %v3436_v0, %s3273_s14  ;;  %s4280_s14 = scalar_lea.vmem %s4255_s5, %s3364_s15 }
  0xd4   : > { %877 = vrot.lane.b32.xlu0 %v3436_v0, %s3274_s29  ;;  %s3276_s29 = smov 64  }
 0x125   : > { %v3441_v1 = vpop.permute.xlu2 %871 }
 0x12d   : > { %v3449_v4 = vpop.permute.xlu2 %869 }
 0x13d   : > { %v3443_v2 = vpop.permute.xlu1 %875 }
 0x13e   : > { %v3445_v3 = vpop.permute.xlu0 %879  ;;  %891 = vrot.lane.b32.xlu2 %v3443_v2, %s3275_s17 }
 0x13f   : > { %895 = vrot.lane.b32.xlu0 %v3445_v3, %s3275_s17 }
 0x145   : > { %v3451_v5 = vpop.permute.xlu1 %873 }
 0x146   : > { %v3453_v6 = vpop.permute.xlu0 %877  ;;  %885 = vrot.lane.b32.xlu2 %v3449_v4, %s3275_s17  ;;  %v906_v35 = vsel %vm897_vm2, %v3451_v5, 0 }
 0x147   : > { %889 = vrot.lane.b32.xlu0 %v3451_v5, %s3275_s17  ;;  %893 = vrot.lane.b32.xlu1 %v3453_v6, %s3275_s17 }
 0x14f   : > { %883 = vrot.lane.b32.xlu0 %v3431_v61, %s3275_s17  ;;  %887 = vrot.lane.b32.xlu1 %v3441_v1, %s3275_s17 }
 0x157   : > { %881 = vrot.lane.b32.xlu1 %v3436_v0, %s3275_s17  ;;  %s4281_s17 = scalar_lea.vmem %s4256_s6, %s3364_s15 }
 0x198   : > { %v892_v7 = vpop.permute.xlu2 %891 }
 0x199   : > { %v924_v11 = vsel %vm897_vm2, %v892_v7, 0  ;;  %v957_v7 = vsub.f32 %v955_v51, %v956_v57 }
 0x19a   : > { %v3470_v13 = vand.u32 4294901760, %v924_v11 }
 0x19c   : > { %v3480_v20 = vsub.f32 %v924_v11, %v3470_v13 }
 0x19e   : > { %v1041_v29 = vand.u32 4294901760, %v3480_v20 }
 0x1a0   : > { %v886_v24 = vpop.permute.xlu2 %885  ;;  %v1042_v38 = vsub.f32 %v3480_v20, %v1041_v29 }
 0x1a1   : > { %v918_v26 = vsel %vm897_vm2, %v886_v24, 0 }
 0x1a2   : > { %v3502_v33 = vand.u32 4294901760, %v918_v26  ;;  %v1043_v45 = vand.u32 4294901760, %v1042_v38 }
 0x1a4   : > { %v3521_v42 = vsub.f32 %v918_v26, %v3502_v33 }
 0x1a6   : > { %v1059_v50 = vand.u32 4294901760, %v3521_v42 }
 0x1a8   : > { %v1060_v62 = vsub.f32 %v3521_v42, %v1059_v50 }
 0x1aa   : > { %v1061_v11 = vand.u32 4294901760, %v1060_v62 }
 0x1b1   : > { %v896_v8 = vpop.permute.xlu0 %895 }
 0x1b2   : > { %v928_v9 = vsel %vm897_vm2, %v896_v8, 0  ;;  %v963_v8 = vsub.f32 %v900_v52, %v3551_v58 }
 0x1b3   : > { %v3462_v10 = vand.u32 4294901760, %v928_v9 }
 0x1b5   : > { %v3466_v12 = vsub.f32 %v928_v9, %v3462_v10  ;;  %939 = vmatpush.xpose.msrb.mxu2 %v3462_v10  ;;  %1190 = vmatpush.xpose.msra.mxu1 %v3462_v10  ;;  %v902_v9 = vsel %vm897_vm2, %v3449_v4, 0 }
 0x1b7   : > { %1118 = vmatpush.xpose.msra.mxu0 %v3466_v12  ;;  %v1029_v14 = vand.u32 4294901760, %v3466_v12 }
 0x1b9   : > { %v894_v15 = vpop.permute.xlu1 %893  ;;  %v890_v16 = vpop.permute.xlu0 %889  ;;  %v1030_v17 = vsub.f32 %v3466_v12, %v1029_v14  ;;  %v904_v12 = vsel %vm897_vm2, %v3441_v1, 0 }
 0x1ba   : > { %v926_v18 = vsel %vm897_vm2, %v894_v15, 0  ;;  %v922_v19 = vsel %vm897_vm2, %v890_v16, 0 }
 0x1bb   : > { %v3482_v21 = vand.u32 4294901760, %v926_v18  ;;  %v3484_v22 = vand.u32 4294901760, %v922_v19  ;;  %v1031_v23 = vand.u32 4294901760, %v1030_v17  ;;  %v3570_v17 = vand.u32 4294901760, %v902_v9 }
 0x1bd   : > { %v3487_v25 = vsub.f32 %v926_v18, %v3482_v21  ;;  %941 = vmatpush.xpose.msrb.mxu2 %v3482_v21  ;;  %1032 = vmatpush.xpose.msrb.mxu3 %v1031_v23  ;;  %v3493_v27 = vsub.f32 %v922_v19, %v3484_v22  ;;  %v958_v18 = vand.u32 4294901760, %v957_v7  ;;  %v964_v19 = vand.u32 4294901760, %v963_v8 }
 0x1be   : > { %1192 = vmatpush.xpose.msra.mxu1 %v3482_v21  ;;  %v971_v26 = vsub.f32 %v902_v9, %v3570_v17 }
 0x1bf   : > { %1121 = vmatpush.xpose.msra.mxu0 %v3487_v25  ;;  %v1035_v28 = vand.u32 4294901760, %v3487_v25  ;;  %v1047_v39 = vand.u32 4294901760, %v3493_v27 }
 0x1c1   : > { %v888_v30 = vpop.permute.xlu1 %887  ;;  %943 = vmatpush.xpose.msrb.mxu2 %v3470_v13  ;;  %v884_v31 = vpop.permute.xlu0 %883  ;;  %v1036_v32 = vsub.f32 %v3487_v25, %v1035_v28  ;;  %v1048_v46 = vsub.f32 %v3493_v27, %v1047_v39 }
 0x1c2   : > { %v920_v34 = vsel %vm897_vm2, %v888_v30, 0  ;;  %1194 = vmatpush.xpose.msra.mxu1 %v3470_v13  ;;  %v916_v40 = vsel %vm897_vm2, %v884_v31, 0  ;;  %v965_v30 = vsub.f32 %v963_v8, %v964_v19  ;;  %v3582_v31 = vand.u32 4294901760, %v904_v12 }
 0x1c3   : > { %v3508_v36 = vand.u32 4294901760, %v920_v34  ;;  %1124 = vmatpush.xpose.msra.mxu0 %v3480_v20  ;;  %v1037_v37 = vand.u32 4294901760, %v1036_v32  ;;  %v3526_v44 = vand.u32 4294901760, %v916_v40  ;;  %v1049_v55 = vand.u32 4294901760, %v1048_v46 }
 0x1c4   : > { %v966_v32 = vand.u32 4294901760, %v965_v30  ;;  %v979_v25 = vsub.f32 %v904_v12, %v3582_v31  ;;  %v3594_v20 = vand.u32 4294901760, %v906_v35 }
 0x1c5   : > { %v3517_v41 = vsub.f32 %v920_v34, %v3508_v36  ;;  %945 = vmatpush.xpose.msrb.mxu2 %v3484_v22  ;;  %1038 = vmatpush.xpose.msrb.mxu3 %v1037_v37  ;;  %v3541_v53 = vsub.f32 %v916_v40, %v3526_v44  ;;  %v972_v34 = vand.u32 4294901760, %v971_v26  ;;  %v908_v37 = vsel %vm897_vm2, %v3443_v2, 0 }
 0x1c6   : > { %1196 = vmatpush.xpose.msra.mxu1 %v3484_v22  ;;  %v994_v38 = vand.u32 4294901760, %v908_v37 }
 0x1c7   : > { %1127 = vmatpush.xpose.msra.mxu0 %v3493_v27  ;;  %v1053_v47 = vand.u32 4294901760, %v3517_v41  ;;  %v1065_v63 = vand.u32 4294901760, %v3541_v53  ;;  %v987_v27 = vsub.f32 %v906_v35, %v3594_v20 }
 0x1c8   : > { %v995_v40 = vsub.f32 %v908_v37, %v994_v38 }
 0x1c9   : > { %v882_v48 = vpop.permute.xlu1 %881  ;;  %947 = vmatpush.xpose.msrb.mxu2 %v3508_v36  ;;  %1044 = vmatpush.xpose.msrb.mxu3 %v1043_v45  ;;  %v1054_v56 = vsub.f32 %v3517_v41, %v1053_v47  ;;  %v1066_v15 = vsub.f32 %v3541_v53, %v1065_v63 }
 0x1ca   : > { %v914_v49 = vsel %vm897_vm2, %v882_v48, 0  ;;  %1198 = vmatpush.xpose.msra.mxu1 %v3508_v36  ;;  %v996_v46 = vand.u32 4294901760, %v995_v40  ;;  %v912_v48 = vsel %vm897_vm2, %v3445_v3, 0 }
 0x1cb   : > { %v3543_v54 = vand.u32 4294901760, %v914_v49  ;;  %1130 = vmatpush.xpose.msra.mxu0 %v3517_v41  ;;  %v1055_v60 = vand.u32 4294901760, %v1054_v56  ;;  %v1067_v23 = vand.u32 4294901760, %v1066_v15 }
 0x1cd   : > { %949 = vmatpush.xpose.msrb.mxu2 %v3502_v33  ;;  %1050 = vmatpush.xpose.msrb.mxu3 %v1049_v55  ;;  %v3554_v59 = vsub.f32 %v914_v49, %v3543_v54  ;;  %v1010_v49 = vand.u32 4294901760, %v912_v48 }
 0x1ce   : > { %1200 = vmatpush.xpose.msra.mxu1 %v3502_v33 }
 0x1cf   : > { %1133 = vmatpush.xpose.msra.mxu0 %v3521_v42  ;;  %v1071_v16 = vand.u32 4294901760, %v3554_v59  ;;  %v910_v42 = vsel %vm897_vm2, %v3453_v6, 0 }
 0x1d1   : > { %951 = vmatpush.xpose.msrb.mxu2 %v3526_v44  ;;  %1056 = vmatpush.xpose.msrb.mxu3 %v1055_v60  ;;  %v1072_v24 = vsub.f32 %v3554_v59, %v1071_v16 }
 0x1d2   : > { %1202 = vmatpush.xpose.msra.mxu1 %v3526_v44 }
 0x1d3   : > { %1136 = vmatpush.xpose.msra.mxu0 %v3541_v53 }
 0x1d5   : > { %953 = vmatpush.xpose.msrb.mxu2 %v3543_v54  ;;  %1062 = vmatpush.xpose.msrb.mxu3 %v1061_v11 }
 0x1d6   : > { %1204 = vmatpush.xpose.msra.mxu1 %v3543_v54 }
 0x1d7   : > { %1139 = vmatpush.xpose.msra.mxu0 %v3554_v59 }
 0x1d8   : > { %959 = vmatmul.f32.vlgmr.msrb.gmra.mxu2 %v958_v18 }
 0x1d9   : > { %1265 = vmatpush.xpose.msra.mxu2 %v1029_v14  ;;  %1208 = vmatmul.f32.vlgmr.msra.gmra.mxu1 %v956_v57  ;;  %v1073_v14 = vand.u32 4294901760, %v1072_v24 }
 0x1da   : > { %1068 = vmatpush.xpose.msrb.mxu3 %v1067_v23  ;;  %1142 = vmatmul.f32.vlgmr.msra.gmra.mxu0 %v955_v51 }
 0x1dd   : > { %1269 = vmatpush.xpose.msra.mxu2 %v1035_v28  ;;  %v973_v28 = vsub.f32 %v971_v26, %v972_v34 }
 0x1de   : > { %1074 = vmatpush.xpose.msrb.mxu3 %v1073_v14 }
 0x1e0   : > { %967 = vmatmul.f32.gmra.mxu2 %v966_v32 }
 0x1e1   : > { %1273 = vmatpush.xpose.msra.mxu2 %v1041_v29  ;;  %1076 = vmatmul.f32.vlgmr.msrb.gmra.mxu3 %v3524_v43  ;;  %v980_v29 = vand.u32 4294901760, %v979_v25 }
 0x1e2   : > { %1336 = vmatpush.xpose.msra.mxu3 %v3462_v10  ;;  %1214 = vmatmul.f32.gmra.mxu1 %v964_v19  ;;  %v974_v10 = vand.u32 4294901760, %v973_v28 }
 0x1e3   : > { %1147 = vmatmul.f32.gmra.mxu0 %v963_v8 }
 0x1e5   : > { %1277 = vmatpush.xpose.msra.mxu2 %v1047_v39 }
 0x1e6   : > { %1338 = vmatpush.xpose.msra.mxu3 %v3482_v21  ;;  %v981_v21 = vsub.f32 %v979_v25, %v980_v29 }
 0x1e8   : > { %975 = vmatmul.f32.gmra.mxu2 %v974_v10  ;;  %v982_v39 = vand.u32 4294901760, %v981_v21  ;;  %v1392_v10 = vld [vmem:[%s4279_s23] sm:$0xff] }
 0x1e9   : > { %1281 = vmatpush.xpose.msra.mxu2 %v1053_v47  ;;  %1080 = vmatmul.f32.gmra.mxu3 %v3551_v58  ;;  %v997_v47 = vsub.f32 %v995_v40, %v996_v46 }
 0x1ea   : > { %1340 = vmatpush.xpose.msra.mxu3 %v3470_v13  ;;  %1220 = vmatmul.f32.gmra.mxu1 %v972_v34  ;;  %v988_v13 = vand.u32 4294901760, %v987_v27 }
 0x1eb   : > { %1152 = vmatmul.f32.gmra.mxu0 %v971_v26 }
 0x1ec   : > { %v989_v41 = vsub.f32 %v987_v27, %v988_v13 }
 0x1ed   : > { %1285 = vmatpush.xpose.msra.mxu2 %v1059_v50  ;;  %v998_v50 = vand.u32 4294901760, %v997_v47 }
 0x1ee   : > { %1342 = vmatpush.xpose.msra.mxu3 %v3484_v22  ;;  %v1002_v22 = vand.u32 4294901760, %v910_v42  ;;  %v990_v45 = vand.u32 4294901760, %v989_v41 }
 0x1f0   : > { %983 = vmatmul.f32.gmra.mxu2 %v982_v39 }
 0x1f1   : > { %1289 = vmatpush.xpose.msra.mxu2 %v1065_v63  ;;  %1084 = vmatmul.f32.gmra.mxu3 %v3570_v17 }
 0x1f2   : > { %1344 = vmatpush.xpose.msra.mxu3 %v3508_v36  ;;  %1226 = vmatmul.f32.gmra.mxu1 %v980_v29  ;;  %v1003_v36 = vsub.f32 %v910_v42, %v1002_v22 }
 0x1f3   : > { %1157 = vmatmul.f32.gmra.mxu0 %v979_v25 }
 0x1f5   : > { %1293 = vmatpush.xpose.msra.mxu2 %v1071_v16 }
 0x1f6   : > { %1346 = vmatpush.xpose.msra.mxu3 %v3502_v33  ;;  %v1004_v33 = vand.u32 4294901760, %v1003_v36 }
 0x1f8   : > { %991 = vmatmul.f32.gmra.mxu2 %v990_v45  ;;  %v1005_v51 = vsub.f32 %v1003_v36, %v1004_v33 }
 0x1f9   : > { %1088 = vmatmul.f32.gmra.mxu3 %v3582_v31 }
 0x1fa   : > { %1348 = vmatpush.xpose.msra.mxu3 %v3526_v44  ;;  %1232 = vmatmul.f32.gmra.mxu1 %v988_v13  ;;  %v1011_v44 = vsub.f32 %v912_v48, %v1010_v49  ;;  %v1006_v52 = vand.u32 4294901760, %v1005_v51 }
 0x1fb   : > { %1162 = vmatmul.f32.gmra.mxu0 %v987_v27 }
 0x1fc   : > { %v1012_v53 = vand.u32 4294901760, %v1011_v44 }
 0x1fe   : > { %1350 = vmatpush.xpose.msra.mxu3 %v3543_v54  ;;  %v1013_v55 = vsub.f32 %v1011_v44, %v1012_v53 }
 0x200   : > { %999 = vmatmul.f32.gmra.mxu2 %v998_v50  ;;  %v1014_v56 = vand.u32 4294901760, %v1013_v55 }
 0x201   : > { %1092 = vmatmul.f32.gmra.mxu3 %v3594_v20 }
 0x202   : > { %1238 = vmatmul.f32.gmra.mxu1 %v996_v46  ;;  %v1393_v46 = vld [vmem:[%s4279_s23 + $0x8] sm:$0xff] }
 0x203   : > { %1167 = vmatmul.f32.gmra.mxu0 %v995_v40 }
 0x208   : > { %1007 = vmatmul.f32.gmra.mxu2 %v1006_v52 }
 0x209   : > { %1096 = vmatmul.f32.gmra.mxu3 %v994_v38 }
 0x20a   : > { %1244 = vmatmul.f32.gmra.mxu1 %v1004_v33 }
 0x20b   : > { %1172 = vmatmul.f32.gmra.mxu0 %v1003_v36 }
 0x210   : > { %1015 = vmatmul.f32.gmra.mxu2 %v1014_v56 }
 0x211   : > { %1100 = vmatmul.f32.gmra.mxu3 %v1002_v22 }
 0x212   : > { %1250 = vmatmul.f32.gmra.mxu1 %v1012_v53 }
 0x213   : > { %1177 = vmatmul.f32.gmra.mxu0 %v1011_v44 }
 0x218   : > { %1295 = vmatmul.f32.vlgmr.msra.gmra.mxu2 %v3524_v43 }
 0x219   : > { %1104 = vmatmul.f32.gmra.mxu3 %v1010_v49 }
 0x220   : > { %1299 = vmatmul.f32.gmra.mxu2 %v3551_v58 }
 0x221   : > { %1352 = vmatmul.f32.vlgmr.msra.gmra.mxu3 %v3524_v43 }
 0x228   : > { %1303 = vmatmul.f32.gmra.mxu2 %v3570_v17 }
 0x229   : > { %1356 = vmatmul.f32.gmra.mxu3 %v3551_v58 }
 0x230   : > { %1307 = vmatmul.f32.gmra.mxu2 %v3582_v31 }
 0x231   : > { %1360 = vmatmul.f32.gmra.mxu3 %v3570_v17 }
 0x238   : > { %1311 = vmatmul.f32.gmra.mxu2 %v3594_v20 }
 0x239   : > { %1364 = vmatmul.f32.gmra.mxu3 %v3582_v31 }
 0x240   : > { %1315 = vmatmul.f32.gmra.mxu2 %v994_v38 }
 0x241   : > { %1368 = vmatmul.f32.gmra.mxu3 %v3594_v20 }
 0x248   : > { %1319 = vmatmul.f32.gmra.mxu2 %v1002_v22 }
 0x249   : > { %1372 = vmatmul.f32.gmra.mxu3 %v994_v38 }
 0x250   : > { %1323 = vmatmul.f32.gmra.mxu2 %v1010_v49 }
 0x251   : > { %1376 = vmatmul.f32.gmra.mxu3 %v1002_v22 }
 0x256   : > { %v1209_v19 = vpop.f32.mrf.mxu1 }
 0x257   : > { %v1143_v16 = vpop.f32.mrf.mxu0 }
 0x259   : > { %1380 = vmatmul.f32.gmra.mxu3 %v1010_v49 }
 0x25b   : > { %v960_v43 = vpop.f32.mrf.mxu2 }
 0x25f   : > { %v1215_v14 = vpop.f32.mrf.mxu1 }
 0x260   : > { %v1148_v12 = vpop.f32.mrf.mxu0 }
 0x263   : > { %v968_v54 = vpop.f32.mrf.mxu2 }
 0x264   : > { %v1077_v57 = vpop.f32.mrf.mxu3 }
 0x265   : > { %v1078_v23 = vadd.f32 %v1077_v57, %v960_v43  ;;  %v1394_v43 = vld [vmem:[%s4279_s23 + $0x10] sm:$0xff] }
 0x267   : > { %v1144_v30 = vadd.f32 %v1143_v16, %v1078_v23  ;;  %v1221_v39 = vpop.f32.mrf.mxu1 }
 0x268   : > { %v1153_v27 = vpop.f32.mrf.mxu0 }
 0x269   : > { %v1210_v32 = vadd.f32 %v1209_v19, %v1144_v30 }
 0x26b   : > { %v976_v58 = vpop.f32.mrf.mxu2 }
 0x26c   : > { %v1081_v59 = vpop.f32.mrf.mxu3 }
 0x26d   : > { %v1082_v31 = vadd.f32 %v1081_v59, %v968_v54 }
 0x26f   : > { %v1149_v35 = vadd.f32 %v1148_v12, %v1082_v31  ;;  %v1227_v55 = vpop.f32.mrf.mxu1 }
 0x270   : > { %v1158_v50 = vpop.f32.mrf.mxu0 }
 0x271   : > { %v1216_v37 = vadd.f32 %v1215_v14, %v1149_v35 }
 0x273   : > { %v984_v60 = vpop.f32.mrf.mxu2 }
 0x274   : > { %v1085_v62 = vpop.f32.mrf.mxu3 }
 0x275   : > { %v1086_v21 = vadd.f32 %v1085_v62, %v976_v58 }
 0x277   : > { %v1154_v22 = vadd.f32 %v1153_v27, %v1086_v21  ;;  %v1233_v12 = vpop.f32.mrf.mxu1 }
 0x279   : > { %v1222_v48 = vadd.f32 %v1221_v39, %v1154_v22 }
 0x27b   : > { %v992_v63 = vpop.f32.mrf.mxu2 }
 0x27c   : > { %v1089_v7 = vpop.f32.mrf.mxu3 }
 0x27d   : > { %v1090_v47 = vadd.f32 %v1089_v7, %v984_v60  ;;  %v1163_v7 = vpop.f32.mrf.mxu0 }
 0x27f   : > { %v1159_v52 = vadd.f32 %v1158_v50, %v1090_v47 }
 0x281   : > { %v1228_v58 = vadd.f32 %v1227_v55, %v1159_v52 }
 0x283   : > { %v3627_v8 = vpop.f32.mrf.mxu2 }
 0x284   : > { %v1093_v9 = vpop.f32.mrf.mxu3 }
 0x285   : > { %v1094_v57 = vadd.f32 %v1093_v9, %v992_v63  ;;  %v1168_v27 = vpop.f32.mrf.mxu0 }
 0x287   : > { %v1164_v19 = vadd.f32 %v1163_v7, %v1094_v57 }
 0x289   : > { %v1234_v63 = vadd.f32 %v1233_v12, %v1164_v19 }
 0x28b   : > { %v3629_v11 = vpop.f32.mrf.mxu2 }
 0x28c   : > { %v3631_v15 = vpop.f32.mrf.mxu3 }
 0x28d   : > { %v1173_v22 = vpop.f32.mrf.mxu0 }
 0x293   : > { %v3633_v17 = vpop.f32.mrf.mxu2 }
 0x294   : > { %v3635_v18 = vpop.f32.mrf.mxu3 }
 0x29b   : > { %v1296_v26 = vpop.f32.mrf.mxu2 }
 0x29c   : > { %v3637_v24 = vpop.f32.mrf.mxu3  ;;  %v1297_v34 = vadd.f32 %v1296_v26, %v1210_v32  ;;  %v1395_v26 = vld [vmem:[%s4279_s23 + $0x18] sm:$0xff] }
 0x2a3   : > { %v1300_v25 = vpop.f32.mrf.mxu2 }
 0x2a4   : > { %v1353_v28 = vpop.f32.mrf.mxu3  ;;  %v1301_v13 = vadd.f32 %v1300_v25, %v1216_v37  ;;  %v1239_v37 = vpop.f32.mrf.mxu1 }
 0x2a5   : > { %v1354_v20 = vadd.f32 %v1353_v28, %v1297_v34  ;;  %v1396_v28 = vld [vmem:[%s4279_s23 + $0x20] sm:$0xff] }
 0x2a7   : > { %v1384_v29 = vmul.f32 0.35355338, %v1354_v20 }
 0x2a9   : > { %v3642_v38 = vadd.f32 %v1392_v10, %v1384_v29  ;;  %v1098_v29 = vadd.f32 %v3631_v15, %v3627_v8  ;;  %v1397_v8 = vld [vmem:[%s4279_s23 + $0x28] sm:$0xff] }
 0x2ab   : > { %v1409_v40 = vsel %vm1408_vm3, %v3642_v38, -inf  ;;  %v1304_v41 = vpop.f32.mrf.mxu2  ;;  %v1169_v21 = vadd.f32 %v1168_v27, %v1098_v29 }
 0x2ac   : > { %v1357_v42 = vpop.f32.mrf.mxu3  ;;  %1410 = vmax.xlane.f32.xlu2 %v1409_v40  ;;  %v1305_v33 = vadd.f32 %v1304_v41, %v1222_v48  ;;  %v1245_v15 = vpop.f32.mrf.mxu1 }
 0x2ad   : > { %v1358_v45 = vadd.f32 %v1357_v42, %v1301_v13  ;;  %v1240_v13 = vadd.f32 %v1239_v37, %v1169_v21  ;;  %v1102_v42 = vadd.f32 %v3635_v18, %v3629_v11  ;;  %v1106_v11 = vadd.f32 %v3637_v24, %v3633_v17  ;;  %v1399_v24 = vld [vmem:[%s4279_s23 + $0x38] sm:$0xff] }
 0x2af   : > { %v1385_v36 = vmul.f32 0.35355338, %v1358_v45 }
 0x2b1   : > { %v3649_v49 = vadd.f32 %v1393_v46, %v1385_v36 }
 0x2b3   : > { %v1412_v44 = vsel %vm1408_vm3, %v3649_v49, -inf  ;;  %v1308_v56 = vpop.f32.mrf.mxu2 }
 0x2b4   : > { %v1361_v51 = vpop.f32.mrf.mxu3  ;;  %1413 = vmax.xlane.f32.xlu0 %v1412_v44  ;;  %v1309_v60 = vadd.f32 %v1308_v56, %v1228_v58  ;;  %v1178_v44 = vpop.f32.mrf.mxu0 }
 0x2b5   : > { %v1362_v53 = vadd.f32 %v1361_v51, %v1305_v33  ;;  %v1398_v51 = vld [vmem:[%s4279_s23 + $0x30] sm:$0xff]  ;;  %v1179_v52 = vadd.f32 %v1178_v44, %v1106_v11  ;;  %v1251_v55 = vpop.f32.mrf.mxu1 }
 0x2b7   : > { %v1386_v54 = vmul.f32 0.35355338, %v1362_v53 }
 0x2b9   : > { %v3656_v59 = vadd.f32 %v1394_v43, %v1386_v54  ;;  %v1252_v43 = vadd.f32 %v1251_v55, %v1179_v52 }
 0x2bb   : > { %v1415_v62 = vsel %vm1408_vm3, %v3656_v59, -inf  ;;  %v1312_v14 = vpop.f32.mrf.mxu2 }
 0x2bc   : > { %v1365_v16 = vpop.f32.mrf.mxu3  ;;  %1416 = vmax.xlane.f32.xlu1 %v1415_v62  ;;  %v1313_v31 = vadd.f32 %v1312_v14, %v1234_v63 }
 0x2bd   : > { %v1366_v23 = vadd.f32 %v1365_v16, %v1309_v60 }
 0x2bf   : > { %v1387_v30 = vmul.f32 0.35355338, %v1366_v23 }
 0x2c1   : > { %v3663_v9 = vadd.f32 %v1395_v26, %v1387_v30 }
 0x2c3   : > { %v1418_v32 = vsel %vm1408_vm3, %v3663_v9, -inf  ;;  %v1316_v39 = vpop.f32.mrf.mxu2 }
 0x2c4   : > { %v1369_v34 = vpop.f32.mrf.mxu3  ;;  %1419 = vmax.xlane.f32.xlu2 %v1418_v32  ;;  %v1317_v41 = vadd.f32 %v1316_v39, %v1240_v13 }
 0x2c5   : > { %v1370_v25 = vadd.f32 %v1369_v34, %v1313_v31 }
 0x2c7   : > { %v1388_v35 = vmul.f32 0.35355338, %v1370_v25 }
 0x2c8   : > { %1507 = vrot.lane.b32.xlu0 %v3443_v2, %s3276_s29 }
 0x2c9   : > { %v3672_v20 = vadd.f32 %v1396_v28, %v1388_v35 }
 0x2cb   : > { %v1421_v10 = vsel %vm1408_vm3, %v3672_v20, -inf  ;;  %v1320_v46 = vpop.f32.mrf.mxu2 }
 0x2cc   : > { %1422 = vmax.xlane.f32.xlu2 %v1421_v10  ;;  %v1373_v40 = vpop.f32.mrf.mxu3 }
 0x2cd   : > { %v1374_v2 = vadd.f32 %v1373_v40, %v1317_v41 }
 0x2cf   : > { %v1389_v45 = vmul.f32 0.35355338, %v1374_v2 }
 0x2d1   : > { %v3687_v36 = vadd.f32 %v1397_v8, %v1389_v45 }
 0x2d3   : > { %v1324_v56 = vpop.f32.mrf.mxu2 }
 0x2d4   : > { %v1377_v48 = vpop.f32.mrf.mxu3  ;;  %v1325_v57 = vadd.f32 %v1324_v56, %v1252_v43 }
 0x2d5   : > { %1509 = vrot.lane.b32.xlu1 %v3453_v6, %s3276_s29  ;;  %v1174_v6 = vadd.f32 %v1173_v22, %v1102_v42 }
 0x2d7   : > { %v1246_v47 = vadd.f32 %v1245_v15, %v1174_v6 }
 0x2d9   : > { %v1321_v50 = vadd.f32 %v1320_v46, %v1246_v47 }
 0x2db   : > { %v1378_v33 = vadd.f32 %v1377_v48, %v1321_v50 }
 0x2dc   : > { %v1381_v54 = vpop.f32.mrf.mxu3 }
 0x2dd   : > { %v1390_v18 = vmul.f32 0.35355338, %v1378_v33  ;;  %v1382_v60 = vadd.f32 %v1381_v54, %v1325_v57 }
 0x2df   : > { %v3696_v53 = vadd.f32 %v1398_v51, %v1390_v18  ;;  %v1391_v17 = vmul.f32 0.35355338, %v1382_v60 }
 0x2e1   : > { %v1427_v58 = vsel %vm1408_vm3, %v3696_v53, -inf  ;;  %v3705_v62 = vadd.f32 %v1399_v24, %v1391_v17 }
 0x2e3   : > { %v1430_v7 = vsel %vm1408_vm3, %v3705_v62, -inf }
 0x2e4   : > { %1511 = vrot.lane.b32.xlu2 %v3445_v3, %s3276_s29  ;;  %v1424_v3 = vsel %vm1408_vm3, %v3687_v36, -inf }
 0x2f2   : > { %1425 = vmax.xlane.f32.xlu0 %v1424_v3 }
 0x2ff   : > { %1428 = vmax.xlane.f32.xlu1 %v1427_v58 }
 0x306   : > { %1503 = vrot.lane.b32.xlu0 %v3441_v1, %s3276_s29 }
 0x30d   : > { %1431 = vmax.xlane.f32.xlu2 %v1430_v7 }
 0x318   : > { %1505 = vrot.lane.b32.xlu1 %v3451_v5, %s3276_s29 }
 0x31f   : > { %v1411_v16 = vpop.xlane.xlu2 %1410 }
 0x320   : > { %v1433_v19 = vsub.f32 %v3642_v38, %v1411_v16 }
 0x322   : > { %v1441_v23 = vmul.f32 1.442695, %v1433_v19 }
 0x324   : > { %3216 = vpow2.f32 %v1441_v23 }
 0x327   : > { %v1414_v30 = vpop.xlane.xlu0 %1413 }
 0x328   : > { %v1434_v12 = vsub.f32 %v3649_v49, %v1414_v30 }
 0x32a   : > { %v3712_v26 = vpop.eup %3216  ;;  %v1443_v14 = vmul.f32 1.442695, %v1434_v12 }
 0x32b   : > { %v1457_v1 = vsel %vm1408_vm3, %v3712_v26, 0.0 }
 0x32c   : > { %3218 = vpow2.f32 %v1443_v14 }
 0x32f   : > { %v1417_v38 = vpop.xlane.xlu1 %1416 }
 0x330   : > { %1458 = vadd.xlane.f32.xlu0 %v1457_v1  ;;  %v1435_v3 = vsub.f32 %v3656_v59, %v1417_v38 }
 0x332   : > { %v3718_v32 = vpop.eup %3218  ;;  %v1445_v11 = vmul.f32 1.442695, %v1435_v3 }
 0x333   : > { %v1460_v35 = vsel %vm1408_vm3, %v3718_v32, 0.0 }
 0x337   : > { %v1420_v63 = vpop.xlane.xlu2 %1419 }
 0x338   : > { %v1436_v31 = vsub.f32 %v3663_v9, %v1420_v63 }
 0x33a   : > { %v1447_v5 = vmul.f32 1.442695, %v1436_v31  ;;  %v1508_v28 = vpop.permute.xlu0 %1507 }
 0x33b   : > { %v3727_v9 = vand.u32 4294901760, %v1508_v28 }
 0x33c   : > { %3220 = vpow2.f32 %v1447_v5 }
 0x33d   : > { %v3732_v21 = vsub.f32 %v1508_v28, %v3727_v9 }
 0x33f   : > { %v1423_v34 = vpop.xlane.xlu2 %1422  ;;  %v1656_v2 = vand.u32 4294901760, %v3732_v21 }
 0x340   : > { %v1437_v25 = vsub.f32 %v3672_v20, %v1423_v34 }
 0x341   : > { %v1657_v8 = vsub.f32 %v3732_v21, %v1656_v2 }
 0x342   : > { %v3723_v10 = vpop.eup %3220  ;;  %v1449_v49 = vmul.f32 1.442695, %v1437_v25  ;;  %1461 = vadd.xlane.f32.xlu1 %v1460_v35 }
 0x343   : > { %v1466_v29 = vsel %vm1408_vm3, %v3723_v10, 0.0  ;;  %v1658_v46 = vand.u32 4294901760, %v1657_v8 }
 0x344   : > { %3222 = vpow2.f32 %v1449_v49  ;;  %1501 = vrot.lane.b32.xlu0 %v3449_v4, %s3276_s29  ;;  %1467 = vadd.xlane.f32.xlu2 %v1466_v29 }
 0x347   : > { %v1510_v27 = vpop.permute.xlu1 %1509  ;;  %v1512_v20 = vpop.permute.xlu2 %1511 }
 0x348   : > { %v3734_v37 = vand.u32 4294901760, %v1510_v27  ;;  %v3736_v39 = vand.u32 4294901760, %v1512_v20 }
 0x34a   : > { %v3738_v13 = vpop.eup %3222  ;;  %v3741_v40 = vsub.f32 %v1510_v27, %v3734_v37  ;;  %v3744_v41 = vsub.f32 %v1512_v20, %v3736_v39  ;;  %1554 = vmatpush.msrb.mxu0 %v3736_v39  ;;  %1805 = vmatpush.msrb.mxu3 %v3736_v39 }
 0x34b   : > { %v1469_v4 = vsel %vm1408_vm3, %v3738_v13, 0.0 }
 0x34c   : > { %v1650_v42 = vand.u32 4294901760, %v3741_v40  ;;  %v1644_v22 = vand.u32 4294901760, %v3744_v41  ;;  %1499 = vrot.lane.b32.xlu0 %v3431_v61, %s3276_s29  ;;  %1556 = vmatpush.msrb.mxu0 %v3734_v37 }
 0x34d   : > { %1733 = vmatpush.msrb.mxu2 %v3744_v41  ;;  %1807 = vmatpush.msrb.mxu3 %v3734_v37 }
 0x34e   : > { %v1645_v45 = vsub.f32 %v3744_v41, %v1644_v22  ;;  %1470 = vadd.xlane.f32.xlu2 %v1469_v4  ;;  %1558 = vmatpush.msrb.mxu0 %v3727_v9  ;;  %v1651_v6 = vsub.f32 %v3741_v40, %v1650_v42 }
 0x34f   : > { %1736 = vmatpush.msrb.mxu2 %v3741_v40  ;;  %1809 = vmatpush.msrb.mxu3 %v3727_v9 }
 0x350   : > { %v1646_v61 = vand.u32 4294901760, %v1645_v45  ;;  %v1652_v15 = vand.u32 4294901760, %v1651_v6 }
 0x351   : > { %1739 = vmatpush.msrb.mxu2 %v3732_v21 }
 0x352   : > { %1647 = vmatpush.msrb.mxu1 %v1646_v61 }
 0x354   : > { %1497 = vrot.lane.b32.xlu0 %v3436_v0, %s3276_s29  ;;  %1653 = vmatpush.msrb.mxu1 %v1652_v15 }
 0x356   : > { %1659 = vmatpush.msrb.mxu1 %v1658_v46 }
 0x365   : > { %v1426_v47 = vpop.xlane.xlu0 %1425 }
 0x366   : > { %v1438_v48 = vsub.f32 %v3687_v36, %v1426_v47 }
 0x368   : > { %v1451_v50 = vmul.f32 1.442695, %v1438_v48 }
 0x36a   : > { %3224 = vpow2.f32 %v1451_v50 }
 0x36b   : > { %3226 = vpow2.f32 %v1445_v11 }
 0x370   : > { %v3775_v33 = vpop.eup %3224 }
 0x371   : > { %v1472_v18 = vsel %vm1408_vm3, %v3775_v33, 0.0  ;;  %v3780_v52 = vpop.eup %3226 }
 0x372   : > { %v1429_v44 = vpop.xlane.xlu1 %1428  ;;  %1473 = vadd.xlane.f32.xlu1 %v1472_v18  ;;  %v1463_v59 = vsel %vm1408_vm3, %v3780_v52, 0.0 }
 0x373   : > { %v1439_v0 = vsub.f32 %v3696_v53, %v1429_v44 }
 0x375   : > { %v1453_v51 = vmul.f32 1.442695, %v1439_v0 }
 0x377   : > { %3228 = vpow2.f32 %v1453_v51 }
 0x378   : > { %v1504_v54 = vpop.permute.xlu0 %1503 }
 0x379   : > { %v3789_v57 = vand.u32 4294901760, %v1504_v54 }
 0x37b   : > { %v3792_v58 = vsub.f32 %v1504_v54, %v3789_v57 }
 0x37d   : > { %v3782_v36 = vpop.eup %3228  ;;  %v1668_v16 = vand.u32 4294901760, %v3792_v58 }
 0x37e   : > { %1464 = vadd.xlane.f32.xlu0 %v1463_v59  ;;  %v1475_v55 = vsel %vm1408_vm3, %v3782_v36, 0.0 }
 0x37f   : > { %1476 = vadd.xlane.f32.xlu2 %v1475_v55  ;;  %v1669_v30 = vsub.f32 %v3792_v58, %v1668_v16 }
 0x380   : > { %v1432_v56 = vpop.xlane.xlu2 %1431 }
 0x381   : > { %v1440_v43 = vsub.f32 %v3705_v62, %v1432_v56  ;;  %v1670_v12 = vand.u32 4294901760, %v1669_v30 }
 0x383   : > { %v1455_v53 = vmul.f32 1.442695, %v1440_v43 }
 0x385   : > { %3230 = vpow2.f32 %v1455_v53 }
 0x38a   : > { %v1506_v60 = vpop.permute.xlu1 %1505 }
 0x38b   : > { %v3794_v17 = vpop.eup %3230  ;;  %v3796_v24 = vand.u32 4294901760, %v1506_v60 }
 0x38c   : > { %v1478_v7 = vsel %vm1408_vm3, %v3794_v17, 0.0 }
 0x38d   : > { %v3802_v62 = vsub.f32 %v1506_v60, %v3796_v24  ;;  %1560 = vmatpush.msrb.mxu0 %v3796_v24  ;;  %1811 = vmatpush.msrb.mxu3 %v3796_v24 }
 0x38e   : > { %1479 = vadd.xlane.f32.xlu1 %v1478_v7 }
 0x38f   : > { %v1662_v19 = vand.u32 4294901760, %v3802_v62  ;;  %1562 = vmatpush.msrb.mxu0 %v3789_v57  ;;  %1742 = vmatpush.msrb.mxu2 %v3802_v62 }
 0x390   : > { %1813 = vmatpush.msrb.mxu3 %v3789_v57 }
 0x391   : > { %1745 = vmatpush.msrb.mxu2 %v3792_v58  ;;  %v1663_v23 = vsub.f32 %v3802_v62, %v1662_v19 }
 0x393   : > { %v1664_v1 = vand.u32 4294901760, %v1663_v23 }
 0x395   : > { %1665 = vmatpush.msrb.mxu1 %v1664_v1 }
 0x397   : > { %1671 = vmatpush.msrb.mxu1 %v1670_v12 }
 0x3a3   : > { %v1459_v14 = vpop.xlane.xlu0 %1458 }
 0x3a4   : > { %3232 = vrcp.f32 %v1459_v14 }
 0x3aa   : > { %v3233_v63 = vpop.eup %3232 }
 0x3ab   : > { %v1489_v31 = vmul.f32 %v3233_v63, %v3712_v26 }
 0x3ad   : > { %v1522_v5 = vsel %vm1408_vm3, %v1489_v31, 0 }
 0x3ae   : > { %v3819_v28 = vand.u32 4294901760, %v1522_v5 }
 0x3b0   : > { %v1570_v27 = vsub.f32 %v1522_v5, %v3819_v28 }
 0x3b2   : > { %v1571_v8 = vand.u32 4294901760, %v1570_v27 }
 0x3b4   : > { %v1572_v48 = vsub.f32 %v1570_v27, %v1571_v8 }
 0x3b5   : > { %v1462_v38 = vpop.xlane.xlu1 %1461 }
 0x3b6   : > { %3234 = vrcp.f32 %v1462_v38  ;;  %v1502_v34 = vpop.permute.xlu0 %1501  ;;  %v1573_v44 = vand.u32 4294901760, %v1572_v48 }
 0x3b7   : > { %v1563_v25 = vand.u32 4294901760, %v1502_v34  ;;  %v1468_v21 = vpop.xlane.xlu2 %1467 }
 0x3b8   : > { %3236 = vrcp.f32 %v1468_v21 }
 0x3b9   : > { %v1673_v35 = vsub.f32 %v1502_v34, %v1563_v25  ;;  %1564 = vmatpush.msrb.mxu0 %v1563_v25  ;;  %1815 = vmatpush.msrb.mxu3 %v1563_v25 }
 0x3bb   : > { %v1674_v49 = vand.u32 4294901760, %v1673_v35  ;;  %1748 = vmatpush.msrb.mxu2 %v1673_v35 }
 0x3bc   : > { %v3235_v29 = vpop.eup %3234 }
 0x3bd   : > { %v1490_v20 = vmul.f32 %v3235_v29, %v3718_v32  ;;  %v1675_v4 = vsub.f32 %v1673_v35, %v1674_v49 }
 0x3be   : > { %v1500_v26 = vpop.permute.xlu0 %1499  ;;  %v3237_v41 = vpop.eup %3236 }
 0x3bf   : > { %v1565_v45 = vand.u32 4294901760, %v1500_v26  ;;  %v1676_v6 = vand.u32 4294901760, %v1675_v4  ;;  %v1525_v61 = vsel %vm1408_vm3, %v1490_v20, 0 }
 0x3c0   : > { %v3824_v15 = vand.u32 4294901760, %v1525_v61 }
 0x3c1   : > { %v1679_v46 = vsub.f32 %v1500_v26, %v1565_v45  ;;  %1566 = vmatpush.msrb.mxu0 %v1565_v45  ;;  %1677 = vmatpush.msrb.mxu1 %v1676_v6 }
 0x3c2   : > { %1817 = vmatpush.msrb.mxu3 %v1565_v45  ;;  %v1578_v50 = vsub.f32 %v1525_v61, %v3824_v15 }
 0x3c3   : > { %v1680_v47 = vand.u32 4294901760, %v1679_v46  ;;  %1751 = vmatpush.msrb.mxu2 %v1679_v46 }
 0x3c4   : > { %v1579_v0 = vand.u32 4294901760, %v1578_v50 }
 0x3c5   : > { %v1681_v3 = vsub.f32 %v1679_v46, %v1680_v47 }
 0x3c6   : > { %v1498_v32 = vpop.permute.xlu0 %1497  ;;  %v1580_v55 = vsub.f32 %v1578_v50, %v1579_v0 }
 0x3c7   : > { %v1567_v11 = vand.u32 4294901760, %v1498_v32  ;;  %v1682_v18 = vand.u32 4294901760, %v1681_v3 }
 0x3c8   : > { %v1581_v54 = vand.u32 4294901760, %v1580_v55 }
 0x3c9   : > { %v1685_v51 = vsub.f32 %v1498_v32, %v1567_v11  ;;  %1568 = vmatpush.msrb.mxu0 %v1567_v11  ;;  %1683 = vmatpush.msrb.mxu1 %v1682_v18 }
 0x3ca   : > { %1819 = vmatpush.msrb.mxu3 %v1567_v11  ;;  %1574 = vmatmul.f32.vlgmr.msrb.gmra.mxu0 %v1573_v44 }
 0x3cb   : > { %v1686_v59 = vand.u32 4294901760, %v1685_v51  ;;  %1823 = vmatmul.f32.vlgmr.msrb.gmra.mxu3 %v1571_v8  ;;  %1880 = vmatpush.msra.mxu0 %v1644_v22 }
 0x3cc   : > { %1754 = vmatpush.msrb.mxu2 %v1685_v51 }
 0x3cd   : > { %1757 = vmatmul.f32.vlgmr.msrb.gmra.mxu2 %v1570_v27  ;;  %1884 = vmatpush.msra.mxu0 %v1650_v42  ;;  %v1687_v56 = vsub.f32 %v1685_v51, %v1686_v59 }
 0x3cf   : > { %1888 = vmatpush.msra.mxu0 %v1656_v2  ;;  %v1688_v43 = vand.u32 4294901760, %v1687_v56 }
 0x3d1   : > { %1892 = vmatpush.msra.mxu0 %v1662_v19  ;;  %1689 = vmatpush.msrb.mxu1 %v1688_v43 }
 0x3d2   : > { %1582 = vmatmul.f32.gmra.mxu0 %v1581_v54  ;;  %1691 = vmatmul.f32.vlgmr.msrb.gmra.mxu1 %v3819_v28 }
 0x3d3   : > { %1829 = vmatmul.f32.gmra.mxu3 %v1579_v0  ;;  %1896 = vmatpush.msra.mxu0 %v1668_v16 }
 0x3d4   : > { %1951 = vmatpush.msra.mxu1 %v3736_v39  ;;  %v1471_v39 = vpop.xlane.xlu2 %1470 }
 0x3d5   : > { %1762 = vmatmul.f32.gmra.mxu2 %v1578_v50  ;;  %1900 = vmatpush.msra.mxu0 %v1674_v49 }
 0x3d6   : > { %1953 = vmatpush.msra.mxu1 %v3734_v37  ;;  %v1492_v37 = vmul.f32 %v3237_v41, %v3723_v10 }
 0x3d7   : > { %1904 = vmatpush.msra.mxu0 %v1680_v47 }
 0x3d8   : > { %1955 = vmatpush.msra.mxu1 %v3727_v9  ;;  %v1531_v22 = vsel %vm1408_vm3, %v1492_v37, 0 }
 0x3d9   : > { %1908 = vmatpush.msra.mxu0 %v1686_v59  ;;  %v3850_v60 = vand.u32 4294901760, %v1531_v22 }
 0x3da   : > { %1957 = vmatpush.msra.mxu1 %v3796_v24 }
 0x3db   : > { %1695 = vmatmul.f32.gmra.mxu1 %v3824_v15 }
 0x3dc   : > { %1959 = vmatpush.msra.mxu1 %v3789_v57 }
 0x3de   : > { %1961 = vmatpush.msra.mxu1 %v1563_v25 }
 0x3e0   : > { %1963 = vmatpush.msra.mxu1 %v1565_v45 }
 0x3e2   : > { %1965 = vmatpush.msra.mxu1 %v1567_v11 }
 0x3e5   : > { %v1474_v2 = vpop.xlane.xlu1 %1473 }
 0x3f1   : > { %v1465_v40 = vpop.xlane.xlu0 %1464 }
 0x3f2   : > { %3238 = vrcp.f32 %v1465_v40  ;;  %v1477_v16 = vpop.xlane.xlu2 %1476 }
 0x3f3   : > { %3240 = vrcp.f32 %v1471_v39 }
 0x3f4   : > { %3242 = vrcp.f32 %v1474_v2 }
 0x3f5   : > { %3244 = vrcp.f32 %v1477_v16 }
 0x3f8   : > { %v3239_v9 = vpop.eup %3238 }
 0x3f9   : > { %v1491_v42 = vmul.f32 %v3239_v9, %v3780_v52  ;;  %v3241_v53 = vpop.eup %3240  ;;  %v1594_v52 = vsub.f32 %v1531_v22, %v3850_v60 }
 0x3fa   : > { %v1493_v24 = vmul.f32 %v3241_v53, %v3738_v13  ;;  %v3243_v19 = vpop.eup %3242 }
 0x3fb   : > { %v1528_v57 = vsel %vm1408_vm3, %v1491_v42, 0  ;;  %v1595_v1 = vand.u32 4294901760, %v1594_v52  ;;  %v1494_v13 = vmul.f32 %v3243_v19, %v3775_v33  ;;  %v3245_v38 = vpop.eup %3244 }
 0x3fc   : > { %v3848_v58 = vand.u32 4294901760, %v1528_v57  ;;  %v1534_v62 = vsel %vm1408_vm3, %v1493_v24, 0  ;;  %v1495_v49 = vmul.f32 %v3245_v38, %v3782_v36 }
 0x3fd   : > { %v3857_v12 = vand.u32 4294901760, %v1534_v62  ;;  %v1596_v14 = vsub.f32 %v1594_v52, %v1595_v1  ;;  %v1537_v5 = vsel %vm1408_vm3, %v1494_v13, 0 }
 0x3fe   : > { %1699 = vmatmul.f32.gmra.mxu1 %v3848_v58  ;;  %v1586_v10 = vsub.f32 %v1528_v57, %v3848_v58  ;;  %v3863_v35 = vand.u32 4294901760, %v1537_v5  ;;  %v1540_v27 = vsel %vm1408_vm3, %v1495_v49, 0 }
 0x3ff   : > { %v1602_v63 = vsub.f32 %v1534_v62, %v3857_v12  ;;  %v1597_v34 = vand.u32 4294901760, %v1596_v14  ;;  %v1617_v45 = vand.u32 4294901760, %v1540_v27 }
 0x400   : > { %1767 = vmatmul.f32.gmra.mxu2 %v1586_v10  ;;  %v1587_v7 = vand.u32 4294901760, %v1586_v10  ;;  %v1610_v29 = vsub.f32 %v1537_v5, %v3863_v35 }
 0x401   : > { %v1480_v31 = vpop.xlane.xlu1 %1479  ;;  %v1603_v25 = vand.u32 4294901760, %v1602_v63  ;;  %v1618_v61 = vsub.f32 %v1540_v27, %v1617_v45 }
 0x402   : > { %1835 = vmatmul.f32.gmra.mxu3 %v1587_v7  ;;  %v1588_v23 = vsub.f32 %v1586_v10, %v1587_v7  ;;  %3246 = vrcp.f32 %v1480_v31  ;;  %v1611_v26 = vand.u32 4294901760, %v1610_v29 }
 0x403   : > { %v1604_v33 = vsub.f32 %v1602_v63, %v1603_v25  ;;  %v1619_v47 = vand.u32 4294901760, %v1618_v61 }
 0x404   : > { %v1589_v30 = vand.u32 4294901760, %v1588_v23  ;;  %v1612_v36 = vsub.f32 %v1610_v29, %v1611_v26 }
 0x405   : > { %v1605_v4 = vand.u32 4294901760, %v1604_v33  ;;  %v1620_v50 = vsub.f32 %v1618_v61, %v1619_v47 }
 0x406   : > { %1590 = vmatmul.f32.gmra.mxu0 %v1589_v30  ;;  %1703 = vmatmul.f32.gmra.mxu1 %v3850_v60  ;;  %v1613_v46 = vand.u32 4294901760, %v1612_v36 }
 0x407   : > { %v1621_v32 = vand.u32 4294901760, %v1620_v50 }
 0x408   : > { %1772 = vmatmul.f32.gmra.mxu2 %v1594_v52  ;;  %v3247_v20 = vpop.eup %3246 }
 0x409   : > { %v1496_v6 = vmul.f32 %v3247_v20, %v3794_v17 }
 0x40a   : > { %1841 = vmatmul.f32.gmra.mxu3 %v1595_v1 }
 0x40b   : > { %v1543_v8 = vsel %vm1408_vm3, %v1496_v6, 0 }
 0x40c   : > { %v1625_v48 = vand.u32 4294901760, %v1543_v8 }
 0x40e   : > { %1598 = vmatmul.f32.gmra.mxu0 %v1597_v34  ;;  %1707 = vmatmul.f32.gmra.mxu1 %v3857_v12  ;;  %v1626_v3 = vsub.f32 %v1543_v8, %v1625_v48 }
 0x410   : > { %1777 = vmatmul.f32.gmra.mxu2 %v1602_v63  ;;  %v1627_v17 = vand.u32 4294901760, %v1626_v3 }
 0x412   : > { %1847 = vmatmul.f32.gmra.mxu3 %v1603_v25  ;;  %v1628_v11 = vsub.f32 %v1626_v3, %v1627_v17 }
 0x414   : > { %v1629_v18 = vand.u32 4294901760, %v1628_v11  ;;  %v2034_v11 = vld [vmem:[%s3377_s25 + $0x18] sm:$0xff] }
 0x416   : > { %1606 = vmatmul.f32.gmra.mxu0 %v1605_v4  ;;  %1711 = vmatmul.f32.gmra.mxu1 %v3863_v35 }
 0x418   : > { %1782 = vmatmul.f32.gmra.mxu2 %v1610_v29 }
 0x41a   : > { %1853 = vmatmul.f32.gmra.mxu3 %v1611_v26 }
 0x41e   : > { %1614 = vmatmul.f32.gmra.mxu0 %v1613_v46  ;;  %1715 = vmatmul.f32.gmra.mxu1 %v1617_v45 }
 0x420   : > { %1787 = vmatmul.f32.gmra.mxu2 %v1618_v61 }
 0x422   : > { %1859 = vmatmul.f32.gmra.mxu3 %v1619_v47 }
 0x426   : > { %1622 = vmatmul.f32.gmra.mxu0 %v1621_v32  ;;  %1719 = vmatmul.f32.gmra.mxu1 %v1625_v48 }
 0x428   : > { %1792 = vmatmul.f32.gmra.mxu2 %v1626_v3 }
 0x42a   : > { %1865 = vmatmul.f32.gmra.mxu3 %v1627_v17 }
 0x42e   : > { %1630 = vmatmul.f32.gmra.mxu0 %v1629_v18  ;;  %1967 = vmatmul.f32.vlgmr.msra.gmra.mxu1 %v3819_v28 }
 0x436   : > { %1910 = vmatmul.f32.vlgmr.msra.gmra.mxu0 %v3819_v28  ;;  %1971 = vmatmul.f32.gmra.mxu1 %v3824_v15 }
 0x43e   : > { %1914 = vmatmul.f32.gmra.mxu0 %v3824_v15  ;;  %1975 = vmatmul.f32.gmra.mxu1 %v3848_v58 }
 0x446   : > { %1918 = vmatmul.f32.gmra.mxu0 %v3848_v58  ;;  %1979 = vmatmul.f32.gmra.mxu1 %v3850_v60 }
 0x447   : > { %v1575_v44 = vpop.f32.mrf.mxu0 }
 0x44e   : > { %1922 = vmatmul.f32.gmra.mxu0 %v3850_v60  ;;  %1983 = vmatmul.f32.gmra.mxu1 %v3857_v12  ;;  %v1824_v55 = vpop.f32.mrf.mxu3 }
 0x44f   : > { %v1692_v0 = vpop.f32.mrf.mxu1  ;;  %v1583_v15 = vpop.f32.mrf.mxu0 }
 0x450   : > { %v1693_v51 = vadd.f32 %v1692_v0, %v1575_v44  ;;  %v1758_v59 = vpop.f32.mrf.mxu2  ;;  %v3891_v44 = vand.u32 4294901760, %v2034_v11 }
 0x452   : > { %v1759_v28 = vadd.f32 %v1758_v59, %v1693_v51  ;;  %3183 = vmatpush.msra.mxu2 %v3891_v44  ;;  %2058 = vmatpush.msrb.mxu0 %v3891_v44 }
 0x454   : > { %v1825_v56 = vadd.f32 %v1824_v55, %v1759_v28  ;;  %v2095_v55 = vsub.f32 %v2034_v11, %v3891_v44 }
 0x456   : > { %1926 = vmatmul.f32.gmra.mxu0 %v3857_v12  ;;  %1987 = vmatmul.f32.gmra.mxu1 %v3863_v35  ;;  %v1830_v40 = vpop.f32.mrf.mxu3 }
 0x458   : > { %v1696_v43 = vpop.f32.mrf.mxu1  ;;  %v1763_v21 = vpop.f32.mrf.mxu2 }
 0x459   : > { %v1697_v54 = vadd.f32 %v1696_v43, %v1583_v15  ;;  %v2096_v15 = vand.u32 4294901760, %v2095_v55 }
 0x45b   : > { %v1764_v39 = vadd.f32 %v1763_v21, %v1697_v54  ;;  %v2097_v21 = vsub.f32 %v2095_v55, %v2096_v15 }
 0x45d   : > { %v1831_v41 = vadd.f32 %v1830_v40, %v1764_v39  ;;  %v2098_v40 = vand.u32 4294901760, %v2097_v21 }
 0x45e   : > { %1930 = vmatmul.f32.gmra.mxu0 %v3863_v35  ;;  %1991 = vmatmul.f32.gmra.mxu1 %v1617_v45 }
 0x45f   : > { %3187 = vmatpush.msra.mxu3 %v2098_v40  ;;  %2099 = vmatpush.msrb.mxu1 %v2098_v40 }
 0x466   : > { %1934 = vmatmul.f32.gmra.mxu0 %v1617_v45  ;;  %1995 = vmatmul.f32.gmra.mxu1 %v1625_v48 }
 0x46e   : > { %1938 = vmatmul.f32.gmra.mxu0 %v1625_v48 }
 0x47b   : > { %v1700_v37 = vpop.f32.mrf.mxu1 }
 0x483   : > { %v1591_v9 = vpop.f32.mrf.mxu0  ;;  %v1704_v2 = vpop.f32.mrf.mxu1 }
 0x484   : > { %v1768_v19 = vpop.f32.mrf.mxu2  ;;  %v1701_v14 = vadd.f32 %v1700_v37, %v1591_v9 }
 0x485   : > { %v1836_v13 = vpop.f32.mrf.mxu3 }
 0x486   : > { %v1769_v34 = vadd.f32 %v1768_v19, %v1701_v14 }
 0x488   : > { %v1837_v49 = vadd.f32 %v1836_v13, %v1769_v34 }
 0x48b   : > { %v1599_v42 = vpop.f32.mrf.mxu0  ;;  %v1708_v22 = vpop.f32.mrf.mxu1 }
 0x48c   : > { %v1773_v38 = vpop.f32.mrf.mxu2  ;;  %v1705_v33 = vadd.f32 %v1704_v2, %v1599_v42 }
 0x48d   : > { %v1842_v35 = vpop.f32.mrf.mxu3 }
 0x48e   : > { %v1774_v4 = vadd.f32 %v1773_v38, %v1705_v33  ;;  %v2031_v33 = vld [vmem:[%s3377_s25] sm:$0xff] }
 0x490   : > { %v1843_v6 = vadd.f32 %v1842_v35, %v1774_v4 }
 0x493   : > { %v1607_v53 = vpop.f32.mrf.mxu0  ;;  %v1712_v57 = vpop.f32.mrf.mxu1 }
 0x494   : > { %v1709_v58 = vadd.f32 %v1708_v22, %v1607_v53  ;;  %v1778_v45 = vpop.f32.mrf.mxu2 }
 0x495   : > { %v1848_v36 = vpop.f32.mrf.mxu3 }
 0x496   : > { %v1779_v28 = vadd.f32 %v1778_v45, %v1709_v58 }
 0x498   : > { %v1849_v39 = vadd.f32 %v1848_v36, %v1779_v28 }
 0x49b   : > { %v1615_v60 = vpop.f32.mrf.mxu0  ;;  %v1716_v24 = vpop.f32.mrf.mxu1 }
 0x49c   : > { %v1783_v48 = vpop.f32.mrf.mxu2  ;;  %v1713_v50 = vadd.f32 %v1712_v57, %v1615_v60 }
 0x49d   : > { %v1854_v32 = vpop.f32.mrf.mxu3 }
 0x49e   : > { %v1784_v17 = vadd.f32 %v1783_v48, %v1713_v50 }
 0x4a0   : > { %v1855_v0 = vadd.f32 %v1854_v32, %v1784_v17 }
 0x4a3   : > { %v1623_v10 = vpop.f32.mrf.mxu0  ;;  %v1720_v7 = vpop.f32.mrf.mxu1 }
 0x4a4   : > { %v3884_v52 = vadd.f32 %v1716_v24, %v1623_v10  ;;  %v1788_v51 = vpop.f32.mrf.mxu2 }
 0x4a5   : > { %v1860_v54 = vpop.f32.mrf.mxu3 }
 0x4a6   : > { %v1789_v24 = vadd.f32 %v1788_v51, %v3884_v52  ;;  %v2032_v52 = vld [vmem:[%s3377_s25 + $0x8] sm:$0xff] }
 0x4ab   : > { %v1631_v16 = vpop.f32.mrf.mxu0  ;;  %v1968_v62 = vpop.f32.mrf.mxu1 }
 0x4ac   : > { %v1793_v42 = vpop.f32.mrf.mxu2 }
 0x4ad   : > { %v1866_v57 = vpop.f32.mrf.mxu3 }
 0x4b3   : > { %v1911_v23 = vpop.f32.mrf.mxu0  ;;  %v1972_v30 = vpop.f32.mrf.mxu1 }
 0x4b4   : > { %v1912_v1 = vadd.f32 %v1911_v23, %v1825_v56  ;;  %v1861_v23 = vadd.f32 %v1860_v54, %v1789_v24 }
 0x4b6   : > { %v3886_v12 = vadd.f32 %v1968_v62, %v1912_v1 }
 0x4bb   : > { %v1915_v63 = vpop.f32.mrf.mxu0  ;;  %v1976_v31 = vpop.f32.mrf.mxu1 }
 0x4bc   : > { %v1916_v5 = vadd.f32 %v1915_v63, %v1831_v41  ;;  %v1721_v41 = vadd.f32 %v1720_v7, %v1631_v16 }
 0x4be   : > { %v3888_v25 = vadd.f32 %v1972_v30, %v1916_v5  ;;  %v1794_v22 = vadd.f32 %v1793_v42, %v1721_v41  ;;  %v2033_v30 = vld [vmem:[%s3377_s25 + $0x10] sm:$0xff]  ;;  %v2061_v5 = vand.u32 4294901760, %v2032_v52 }
 0x4bf   : > { %v2059_v1 = vand.u32 4294901760, %v2033_v30 }
 0x4c0   : > { %v1867_v58 = vadd.f32 %v1866_v57, %v1794_v22  ;;  %v2107_v38 = vsub.f32 %v2032_v52, %v2061_v5  ;;  %v3263_v52 = vld [vmem:[#allocation2 + $0x8] sm:$0xff] }
 0x4c1   : > { %3184 = vmatpush.msra.mxu2 %v2059_v1  ;;  %2060 = vmatpush.msrb.mxu0 %v2059_v1  ;;  %v2101_v13 = vsub.f32 %v2033_v30, %v2059_v1 }
 0x4c2   : > { %v2108_v34 = vand.u32 4294901760, %v2107_v38 }
 0x4c3   : > { %v1919_v29 = vpop.f32.mrf.mxu0  ;;  %v1980_v20 = vpop.f32.mrf.mxu1  ;;  %v2102_v14 = vand.u32 4294901760, %v2101_v13  ;;  %3185 = vmatpush.msra.mxu2 %v2061_v5  ;;  %2062 = vmatpush.msrb.mxu0 %v2061_v5 }
 0x4c4   : > { %v1920_v27 = vadd.f32 %v1919_v29, %v1837_v49  ;;  %v2109_v35 = vsub.f32 %v2107_v38, %v2108_v34  ;;  %v2063_v29 = vand.u32 4294901760, %v2031_v33 }
 0x4c5   : > { %v2103_v63 = vsub.f32 %v2101_v13, %v2102_v14 }
 0x4c6   : > { %v1977_v26 = vadd.f32 %v1976_v31, %v1920_v27  ;;  %v2110_v49 = vand.u32 4294901760, %v2109_v35  ;;  %3186 = vmatpush.msra.mxu2 %v2063_v29  ;;  %v2113_v27 = vsub.f32 %v2031_v33, %v2063_v29  ;;  %2064 = vmatpush.msrb.mxu0 %v2063_v29 }
 0x4c7   : > { %v2104_v31 = vand.u32 4294901760, %v2103_v63 }
 0x4c8   : > { %2001 = vrot.lane.b32.xlu0 %v1977_v26, %s3277_s30  ;;  %2210 = vmatpush.msrb.mxu2 %v2096_v15 }
 0x4c9   : > { %3188 = vmatpush.msra.mxu3 %v2104_v31  ;;  %2105 = vmatpush.msrb.mxu1 %v2104_v31 }
 0x4ca   : > { %2141 = vmatpush.msra.mxu0 %v2095_v55  ;;  %2214 = vmatpush.msrb.mxu2 %v2102_v14 }
 0x4cb   : > { %v1923_v61 = vpop.f32.mrf.mxu0  ;;  %v1984_v47 = vpop.f32.mrf.mxu1  ;;  %3189 = vmatpush.msra.mxu3 %v2110_v49  ;;  %2111 = vmatpush.msrb.mxu1 %v2110_v49 }
 0x4cc   : > { %v1924_v8 = vadd.f32 %v1923_v61, %v1843_v6  ;;  %2144 = vmatpush.msra.mxu0 %v2101_v13  ;;  %2218 = vmatpush.msrb.mxu2 %v2108_v34  ;;  %v3280_v34 = vmov 32.0  }
 0x4cd   : > { %3248 = vrcp.f32 %v3280_v34 }
 0x4ce   : > { %v1981_v46 = vadd.f32 %v1980_v20, %v1924_v8  ;;  %v2114_v20 = vand.u32 4294901760, %v2113_v27  ;;  %2147 = vmatpush.msra.mxu0 %v2107_v38 }
 0x4d0   : > { %2003 = vrot.lane.b32.xlu2 %v1981_v46, %s3277_s30  ;;  %v2115_v4 = vsub.f32 %v2113_v27, %v2114_v20  ;;  %2222 = vmatpush.msrb.mxu2 %v2114_v20 }
 0x4d1   : > { %2150 = vmatpush.msra.mxu0 %v2113_v27 }
 0x4d2   : > { %v2116_v26 = vand.u32 4294901760, %v2115_v4 }
 0x4d3   : > { %v1927_v3 = vpop.f32.mrf.mxu0  ;;  %v1988_v18 = vpop.f32.mrf.mxu1 }
 0x4d4   : > { %v1928_v37 = vadd.f32 %v1927_v3, %v1849_v39  ;;  %3190 = vmatpush.msra.mxu3 %v2116_v26  ;;  %2117 = vmatpush.msrb.mxu1 %v2116_v26  ;;  %v3209_v39 = vld [vmem:[%s4280_s14] ss:$0 sm:$0xff]  ;;  %v3249_v35 = vpop.eup %3248 }
 0x4d5   : > { %v2272_v49 = vmul.f32 32.0, %v3249_v35  ;;  %vm2276_vm6 = vweird.f32 %v3249_v35 }
 0x4d6   : > { %v1985_v53 = vadd.f32 %v1984_v47, %v1928_v37  ;;  %2245 = vmatpush.msrb.mxu3 %v3891_v44  ;;  %2175 = vmatpush.msra.mxu1 %v3891_v44 }
 0x4d7   : > { %v2273_v33 = vsub.f32 1.0, %v2272_v49 }
 0x4d8   : > { %2247 = vmatpush.msrb.mxu3 %v2059_v1  ;;  %2177 = vmatpush.msra.mxu1 %v2059_v1 }
 0x4da   : > { %2249 = vmatpush.msrb.mxu3 %v2061_v5  ;;  %2179 = vmatpush.msra.mxu1 %v2061_v5 }
 0x4db   : > { %v1931_v59 = vpop.f32.mrf.mxu0  ;;  %v1992_v9 = vpop.f32.mrf.mxu1 }
 0x4dc   : > { %v1932_v56 = vadd.f32 %v1931_v59, %v1855_v0  ;;  %2251 = vmatpush.msrb.mxu3 %v2063_v29  ;;  %2181 = vmatpush.msra.mxu1 %v2063_v29  ;;  %v2274_v29 = vmul.f32 %v3249_v35, %v2273_v33 }
 0x4de   : > { %v1989_v43 = vadd.f32 %v1988_v18, %v1932_v56  ;;  %v2275_v27 = vadd.f32 %v3249_v35, %v2274_v29 }
 0x4e0   : > { %2011 = vrot.lane.b32.xlu1 %v1989_v43, %s3278_s22  ;;  %v3919_v20 = vsel %vm2276_vm6, %v3249_v35, %v2275_v27 }
 0x4e3   : > { %v1935_v2 = vpop.f32.mrf.mxu0  ;;  %v1996_v62 = vpop.f32.mrf.mxu1 }
 0x4e4   : > { %v1936_v7 = vadd.f32 %v1935_v2, %v1861_v23  ;;  %v3262_v23 = vld [vmem:[#allocation2] sm:$0xff] }
 0x4e6   : > { %v1993_v16 = vadd.f32 %v1992_v9, %v1936_v7 }
 0x4e8   : > { %2009 = vrot.lane.b32.xlu1 %v1985_v53, %s3278_s22 }
 0x4eb   : > { %v1939_v60 = vpop.f32.mrf.mxu0 }
 0x4ec   : > { %v1940_v10 = vadd.f32 %v1939_v60, %v1867_v58 }
 0x4ee   : > { %v1997_v19 = vadd.f32 %v1996_v62, %v1940_v10 }
 0x4f0   : > { %2019 = vrot.lane.b32.xlu2 %v1997_v19, %s3279_s18 }
 0x4f8   : > { %2017 = vrot.lane.b32.xlu2 %v1993_v16, %s3279_s18 }
 0x52a   : > { %v2004_v45 = vpop.permute.xlu2 %2003 }
 0x52b   : > { %v2024_v36 = vsel %vm897_vm2, %v3888_v25, %v2004_v45 }
 0x53a   : > { %v2002_v50 = vpop.permute.xlu0 %2001 }
 0x53b   : > { %v2023_v32 = vsel %vm897_vm2, %v3886_v12, %v2002_v50  ;;  %v2329_v50 = vld [vmem:[%s3394_s21 + $0x18] sm:$0xff] }
 0x54a   : > { %v2020_v6 = vpop.permute.xlu2 %2019 }
 0x552   : > { %v2012_v61 = vpop.permute.xlu1 %2011  ;;  %v2018_v18 = vpop.permute.xlu2 %2017 }
 0x553   : > { %v2027_v8 = vsel %vm2025_vm4, %v2024_v36, %v2012_v61 }
 0x554   : > { %v2030_v46 = vsel %vm2028_vm5, %v2027_v8, %v2020_v6 }
 0x555   : > { %v2043_v47 = vsel %vm644_vm1, %v2030_v46, 0 }
 0x556   : > { %v2073_v48 = vand.u32 4294901760, %v2043_v47 }
 0x558   : > { %v2074_v3 = vsub.f32 %v2043_v47, %v2073_v48  ;;  %2123 = vmatmul.f32.vlgmr.msra.gmra.mxu3 %v2073_v48 }
 0x55a   : > { %v2075_v17 = vand.u32 4294901760, %v2074_v3  ;;  %v2010_v11 = vpop.permute.xlu1 %2009 }
 0x55b   : > { %v2026_v44 = vsel %vm2025_vm4, %v2023_v32, %v2010_v11  ;;  %v2328_v32 = vld [vmem:[%s3394_s21 + $0x10] sm:$0xff] }
 0x55c   : > { %v2076_v25 = vsub.f32 %v2074_v3, %v2075_v17  ;;  %v2029_v0 = vsel %vm2028_vm5, %v2026_v44, %v2018_v18  ;;  %v2354_v11 = vand.u32 4294901760, %v2328_v32  ;;  %v2327_v18 = vld [vmem:[%s3394_s21 + $0x8] sm:$0xff] }
 0x55d   : > { %v2040_v51 = vsel %vm644_vm1, %v2029_v0, 0  ;;  %v2356_v0 = vand.u32 4294901760, %v2327_v18 }
 0x55e   : > { %v2077_v59 = vand.u32 4294901760, %v2076_v25  ;;  %v2065_v55 = vand.u32 4294901760, %v2040_v51  ;;  %v2396_v25 = vsub.f32 %v2328_v32, %v2354_v11 }
 0x560   : > { %v2066_v28 = vsub.f32 %v2040_v51, %v2065_v55  ;;  %2078 = vmatmul.f32.vlgmr.msra.gmra.mxu2 %v2077_v59  ;;  %2119 = vmatmul.f32.vlgmr.msrb.gmra.mxu1 %v2065_v55  ;;  %v2326_v51 = vld [vmem:[%s3394_s21] sm:$0xff]  ;;  %s4284_s21 = sld [smem:[#allocation8_spill]] }
 0x561   : > { %2253 = vmatmul.f32.vlgmr.msrb.gmra.mxu3 %v2065_v55 }
 0x562   : > { %v2067_v56 = vand.u32 4294901760, %v2066_v28 }
 0x564   : > { %v2068_v15 = vsub.f32 %v2066_v28, %v2067_v56 }
 0x566   : > { %v2069_v12 = vand.u32 4294901760, %v2068_v15 }
 0x568   : > { %2070 = vmatmul.f32.vlgmr.msrb.gmra.mxu0 %v2069_v12  ;;  %2185 = vmatmul.f32.vlgmr.msra.gmra.mxu1 %v2067_v56  ;;  %v2358_v56 = vand.u32 4294901760, %v2326_v51 }
 0x569   : > { %2224 = vmatmul.f32.vlgmr.msrb.gmra.mxu2 %v2065_v55  ;;  %2257 = vmatmul.f32.gmra.mxu3 %v2073_v48  ;;  %v2397_v55 = vand.u32 4294901760, %v2396_v25 }
 0x56b   : > { %v2398_v12 = vsub.f32 %v2396_v25, %v2397_v55 }
 0x570   : > { %2153 = vmatmul.f32.vlgmr.msra.gmra.mxu0 %v2066_v28  ;;  %2191 = vmatmul.f32.gmra.mxu1 %v2075_v17  ;;  %v2402_v28 = vsub.f32 %v2327_v18, %v2356_v0 }
 0x571   : > { %2228 = vmatmul.f32.gmra.mxu2 %v2073_v48 }
 0x578   : > { %2158 = vmatmul.f32.gmra.mxu0 %v2074_v3  ;;  %v2352_v3 = vand.u32 4294901760, %v2329_v50 }
 0x57a   : > { %2353 = vmatpush.msrb.mxu0 %v2352_v3  ;;  %v2390_v17 = vsub.f32 %v2329_v50, %v2352_v3  ;;  %2470 = vmatpush.msra.mxu3 %v2352_v3 }
 0x57c   : > { %v2391_v44 = vand.u32 4294901760, %v2390_v17  ;;  %2436 = vmatpush.msra.mxu2 %v2390_v17  ;;  %2355 = vmatpush.msrb.mxu0 %v2354_v11 }
 0x57d   : > { %2472 = vmatpush.msra.mxu3 %v2354_v11 }
 0x57e   : > { %v2392_v59 = vsub.f32 %v2390_v17, %v2391_v44  ;;  %2439 = vmatpush.msra.mxu2 %v2396_v25  ;;  %2357 = vmatpush.msrb.mxu0 %v2356_v0  ;;  %v2588_v17 = vld [vmem:[%s3404_s28 + $0x70] sm:$0xff] }
 0x57f   : > { %2474 = vmatpush.msra.mxu3 %v2356_v0  ;;  %v3966_v18 = vand.u32 4294901760, %v2588_v17 }
 0x580   : > { %v2393_v15 = vand.u32 4294901760, %v2392_v59  ;;  %2442 = vmatpush.msra.mxu2 %v2402_v28  ;;  %2359 = vmatpush.msrb.mxu0 %v2358_v56  ;;  %v2586_v59 = vld [vmem:[%s3404_s28 + $0x60] sm:$0xff] }
 0x581   : > { %2476 = vmatpush.msra.mxu3 %v2358_v56 }
 0x582   : > { %2505 = vmatpush.msra.mxu0 %v2391_v44  ;;  %2394 = vmatpush.msrb.mxu1 %v2393_v15  ;;  %v2587_v44 = vld [vmem:[%s3404_s28 + $0x68] sm:$0xff]  ;;  %v3988_v15 = vand.u32 4294901760, %v2586_v59 }
 0x584   : > { %2509 = vmatpush.msra.mxu0 %v2397_v55 }
 0x5db   : > { %v2124_v40 = vpop.f32.mrf.mxu3 }
 0x5dd   : > { %v2120_v43 = vpop.f32.mrf.mxu1 }
 0x5e3   : > { %v2079_v54 = vpop.f32.mrf.mxu2 }
 0x5e4   : > { %v2080_v53 = vadd.f32 %v3209_v39, %v2079_v54  ;;  %v2254_v58 = vpop.f32.mrf.mxu3  ;;  %v2408_v54 = vsub.f32 %v2326_v51, %v2358_v56  ;;  %v3975_v51 = vand.u32 4294901760, %v2587_v44 }
 0x5e5   : > { %v2071_v21 = vpop.f32.mrf.mxu0  ;;  %v2186_v9 = vpop.f32.mrf.mxu1 }
 0x5e6   : > { %v2072_v41 = vadd.f32 %v3209_v39, %v2071_v21  ;;  %v2125_v24 = vadd.f32 %v2124_v40, %v2080_v53  ;;  %v2399_v21 = vand.u32 4294901760, %v2398_v12  ;;  %v2409_v40 = vand.u32 4294901760, %v2408_v54  ;;  %2445 = vmatpush.msra.mxu2 %v2408_v54  ;;  %v2585_v12 = vld [vmem:[%s3404_s28 + $0x58] sm:$0xff] }
 0x5e8   : > { %v2121_v37 = vadd.f32 %v2120_v43, %v2072_v41  ;;  %v2403_v43 = vand.u32 4294901760, %v2402_v28  ;;  %2400 = vmatpush.msrb.mxu1 %v2399_v21 }
 0x5ea   : > { %v2404_v39 = vsub.f32 %v2402_v28, %v2403_v43  ;;  %2513 = vmatpush.msra.mxu0 %v2403_v43 }
 0x5ec   : > { %v2225_v22 = vpop.f32.mrf.mxu2  ;;  %v2258_v63 = vpop.f32.mrf.mxu3  ;;  %v2405_v41 = vand.u32 4294901760, %v2404_v39  ;;  %2517 = vmatpush.msra.mxu0 %v2409_v40  ;;  %v3999_v39 = vsub.f32 %v2586_v59, %v3988_v15 }
 0x5ed   : > { %v2154_v2 = vpop.f32.mrf.mxu0  ;;  %v2192_v16 = vpop.f32.mrf.mxu1 }
 0x5ee   : > { %v2155_v42 = vadd.f32 %v2154_v2, %v2121_v37  ;;  %v2410_v37 = vsub.f32 %v2408_v54, %v2409_v40  ;;  %2406 = vmatpush.msrb.mxu1 %v2405_v41  ;;  %v4003_v40 = vand.u32 4294901760, %v2585_v12  ;;  %v2584_v41 = vld [vmem:[%s3404_s28 + $0x50] sm:$0xff] }
 0x5f0   : > { %v2187_v57 = vadd.f32 %v2186_v9, %v2155_v42  ;;  %v2411_v9 = vand.u32 4294901760, %v2410_v37 }
 0x5f2   : > { %v2226_v60 = vadd.f32 %v2225_v22, %v2187_v57  ;;  %2412 = vmatpush.msrb.mxu1 %v2411_v9 }
 0x5f4   : > { %v2255_v10 = vadd.f32 %v2254_v58, %v2226_v60  ;;  %v2229_v13 = vpop.f32.mrf.mxu2  ;;  %2540 = vmatpush.msra.mxu1 %v2352_v3  ;;  %v2589_v3 = vld [vmem:[%s3404_s28 + $0x78] sm:$0xff] }
 0x5f5   : > { %v2159_v62 = vpop.f32.mrf.mxu0  ;;  %v3960_v32 = vand.u32 4294901760, %v2589_v3 }
 0x5f6   : > { %v2160_v19 = vadd.f32 %v2159_v62, %v2125_v24  ;;  %v2261_v7 = vadd.f32 %v3262_v23, %v2255_v10  ;;  %2542 = vmatpush.msra.mxu1 %v2354_v11 }
 0x5f7   : > { %v3964_v11 = vsub.f32 %v2589_v3, %v3960_v32  ;;  %2595 = vmatpush.msrb.mxu2 %v3960_v32 }
 0x5f8   : > { %v2193_v30 = vadd.f32 %v2192_v16, %v2160_v19  ;;  %v2265_v1 = vsel %vm644_vm1, %v2261_v7, 0.0  ;;  %2544 = vmatpush.msra.mxu1 %v2356_v0  ;;  %v3973_v0 = vsub.f32 %v2588_v17, %v3966_v18  ;;  %v2577_v17 = vld [vmem:[%s3404_s28 + $0x18] sm:$0xff] }
 0x5f9   : > { %2266 = vadd.xlane.f32.xlu0 %v2265_v1  ;;  %v2645_v25 = vand.u32 4294901760, %v3964_v11  ;;  %2597 = vmatpush.msrb.mxu2 %v3966_v18 }
 0x5fa   : > { %v2230_v14 = vadd.f32 %v2229_v13, %v2193_v30  ;;  %2546 = vmatpush.msra.mxu1 %v2358_v56  ;;  %v3210_v30 = vld [vmem:[%s4281_s17] ss:$0 sm:$0xff]  ;;  %v2651_v28 = vand.u32 4294901760, %v3973_v0  ;;  %v3986_v56 = vsub.f32 %v2587_v44, %v3975_v51 }
 0x5fb   : > { %v2646_v55 = vsub.f32 %v3964_v11, %v2645_v25  ;;  %2599 = vmatpush.msrb.mxu2 %v3975_v51 }
 0x5fc   : > { %v2259_v31 = vadd.f32 %v2258_v63, %v2230_v14  ;;  %v3211_v14 = vld [vmem:[%s4282_s24] ss:$0 sm:$0xff]  ;;  %v2652_v54 = vsub.f32 %v3973_v0, %v2651_v28  ;;  %v2657_v21 = vand.u32 4294901760, %v3986_v56 }
 0x5fd   : > { %v2647_v43 = vand.u32 4294901760, %v2646_v55  ;;  %2601 = vmatpush.msrb.mxu2 %v3988_v15 }
 0x5fe   : > { %v2262_v5 = vadd.f32 %v3263_v52, %v2259_v31  ;;  %v2653_v37 = vand.u32 4294901760, %v2652_v54  ;;  %v2658_v9 = vsub.f32 %v3986_v56, %v2657_v21  ;;  %v2576_v54 = vld [vmem:[%s3404_s28 + $0x10] sm:$0xff] }
 0x5ff   : > { %2648 = vmatpush.msrb.mxu3 %v2647_v43  ;;  %2603 = vmatpush.msrb.mxu2 %v4003_v40 }
 0x600   : > { %v2268_v38 = vsel %vm644_vm1, %v2262_v5, 0.0 }
 0x601   : > { %2269 = vadd.xlane.f32.xlu1 %v2268_v38  ;;  %2654 = vmatpush.msrb.mxu3 %v2653_v37 }
 0x66c   : > { %v2267_v4 = vpop.xlane.xlu0 %2266 }
 0x66d   : > { %v2278_v26 = vmul.f32 %v3919_v20, %v2267_v4 }
 0x66f   : > { %v3922_v45 = vsub.f32 %v2261_v7, %v2278_v26 }
 0x671   : > { %v2282_v6 = vmul.f32 %v3922_v45, %v3922_v45 }
 0x673   : > { %v2284_v36 = vsel %vm644_vm1, %v2282_v6, 0.0 }
 0x674   : > { %v2270_v61 = vpop.xlane.xlu1 %2269  ;;  %2285 = vadd.xlane.f32.xlu2 %v2284_v36 }
 0x675   : > { %v2279_v8 = vmul.f32 %v3919_v20, %v2270_v61 }
 0x677   : > { %v3928_v46 = vsub.f32 %v2262_v5, %v2279_v8 }
 0x679   : > { %v2283_v47 = vmul.f32 %v3928_v46, %v3928_v46 }
 0x67b   : > { %v2287_v48 = vsel %vm644_vm1, %v2283_v47, 0.0 }
 0x67c   : > { %2288 = vadd.xlane.f32.xlu0 %v2287_v48 }
 0x6e7   : > { %v2286_v2 = vpop.xlane.xlu2 %2285 }
 0x6e8   : > { %v2290_v42 = vmul.f32 %v2286_v2, %v3919_v20  ;;  %v2663_v2 = vand.u32 4294901760, %v3999_v39 }
 0x6ea   : > { %v2292_v22 = vadd.f32 1e-12, %v2290_v42  ;;  %v4011_v42 = vand.u32 4294901760, %v2584_v41 }
 0x6ec   : > { %3250 = vrsqrt.f32 %v2292_v22  ;;  %vm2300_vm8 = vweird.f32 %v2292_v22  ;;  %2605 = vmatpush.msrb.mxu2 %v4011_v42 }
 0x6ef   : > { %v2289_v53 = vpop.xlane.xlu0 %2288 }
 0x6f0   : > { %v2291_v57 = vmul.f32 %v2289_v53, %v3919_v20  ;;  %v2583_v53 = vld [vmem:[%s3404_s28 + $0x48] sm:$0xff] }
 0x6f2   : > { %v3251_v58 = vpop.eup %3250  ;;  %v2293_v60 = vadd.f32 1e-12, %v2291_v57  ;;  %v2659_v57 = vand.u32 4294901760, %v2658_v9 }
 0x6f3   : > { %v2295_v24 = vmul.f32 %v3251_v58, %v2292_v22  ;;  %vm2301_vm7 = vweird.f32 %v3251_v58  ;;  %v4015_v22 = vsub.f32 %v2585_v12, %v4003_v40  ;;  %v4100_v12 = vand.u32 4294901760, %v2577_v17 }
 0x6f4   : > { %3252 = vrsqrt.f32 %v2293_v60  ;;  %vm2302_vm9 = vmor %vm2300_vm8, %vm2301_vm7  ;;  %vm2310_vm11 = vweird.f32 %v2293_v60  ;;  %2660 = vmatpush.msrb.mxu3 %v2659_v57 }
 0x6f5   : > { %v2296_v10 = vmul.f32 %v3251_v58, %v2295_v24  ;;  %v4026_v24 = vand.u32 4294901760, %v2583_v53  ;;  %v4114_v9 = vsub.f32 %v2577_v17, %v4100_v12 }
 0x6f7   : > { %v2297_v62 = vmul.f32 0.5, %v2296_v10  ;;  %v2669_v10 = vand.u32 4294901760, %v4015_v22  ;;  %2607 = vmatpush.msrb.mxu2 %v4026_v24 }
 0x6f9   : > { %v2298_v19 = vsub.f32 1.5, %v2297_v62  ;;  %v2582_v62 = vld [vmem:[%s3404_s28 + $0x40] sm:$0xff] }
 0x6fa   : > { %v3253_v23 = vpop.eup %3252 }
 0x6fb   : > { %v2299_v7 = vmul.f32 %v3251_v58, %v2298_v19  ;;  %v2305_v16 = vmul.f32 %v3253_v23, %v2293_v60  ;;  %vm2311_vm10 = vweird.f32 %v3253_v23  ;;  %v4024_v60 = vsub.f32 %v2584_v41, %v4011_v42 }
 0x6fc   : > { %vm2312_vm12 = vmor %vm2310_vm11, %vm2311_vm10 }
 0x6fd   : > { %v2303_v1 = vsel %vm2302_vm9, %v3251_v58, %v2299_v7  ;;  %v2306_v13 = vmul.f32 %v3253_v23, %v2305_v16  ;;  %v2664_v58 = vsub.f32 %v3999_v39, %v2663_v2  ;;  %v4034_v7 = vsub.f32 %v2583_v53, %v4026_v24 }
 0x6fe   : > { %v2314_v63 = vmul.f32 %v2303_v1, %v3922_v45  ;;  %v4036_v16 = vand.u32 4294901760, %v2582_v62  ;;  %v2581_v1 = vld [vmem:[%s3404_s28 + $0x38] sm:$0xff]  ;;  %v4116_v53 = vand.u32 4294901760, %v2576_v54 }
 0x6ff   : > { %v2307_v31 = vmul.f32 0.5, %v2306_v13  ;;  %v2665_v19 = vand.u32 4294901760, %v2664_v58  ;;  %v2575_v58 = vld [vmem:[%s3404_s28 + $0x8] sm:$0xff] }
 0x700   : > { %v2319_v52 = vmul.f32 %v3210_v30, %v2314_v63  ;;  %v4050_v63 = vsub.f32 %v2582_v62, %v4036_v16  ;;  %2609 = vmatpush.msrb.mxu2 %v4036_v16 }
 0x701   : > { %v2308_v5 = vsub.f32 1.5, %v2307_v31  ;;  %2666 = vmatpush.msrb.mxu3 %v2665_v19  ;;  %v4052_v31 = vand.u32 4294901760, %v2581_v1 }
 0x702   : > { %v3950_v38 = vadd.f32 %v3211_v14, %v2319_v52 }
 0x703   : > { %v2309_v34 = vmul.f32 %v3253_v23, %v2308_v5  ;;  %v2580_v5 = vld [vmem:[%s3404_s28 + $0x30] sm:$0xff]  ;;  %2611 = vmatpush.msrb.mxu2 %v4052_v31 }
 0x704   : > { %v2335_v35 = vsel %vm644_vm1, %v3950_v38, 0 }
 0x705   : > { %v2313_v49 = vsel %vm2312_vm12, %v3253_v23, %v2309_v34  ;;  %v2360_v33 = vand.u32 4294901760, %v2335_v35  ;;  %v2675_v23 = vand.u32 4294901760, %v4024_v60 }
 0x706   : > { %v2315_v29 = vmul.f32 %v2313_v49, %v3928_v46  ;;  %v2687_v49 = vand.u32 4294901760, %v4050_v63 }
 0x707   : > { %2414 = vmatmul.f32.vlgmr.msrb.gmra.mxu1 %v2360_v33  ;;  %v2361_v27 = vsub.f32 %v2335_v35, %v2360_v33  ;;  %v2676_v13 = vsub.f32 %v4024_v60, %v2675_v23 }
 0x708   : > { %v2320_v4 = vmul.f32 %v3210_v30, %v2315_v29  ;;  %2808 = vmatpush.msrb.mxu1 %v3960_v32  ;;  %v2670_v30 = vsub.f32 %v4015_v22, %v2669_v10  ;;  %v4066_v29 = vand.u32 4294901760, %v2580_v5 }
 0x709   : > { %2448 = vmatmul.f32.vlgmr.msra.gmra.mxu2 %v2361_v27  ;;  %v2362_v26 = vand.u32 4294901760, %v2361_v27  ;;  %v2677_v34 = vand.u32 4294901760, %v2676_v13  ;;  %v4131_v13 = vand.u32 4294901760, %v2575_v58 }
 0x70a   : > { %v3955_v45 = vadd.f32 %v3211_v14, %v2320_v4  ;;  %2810 = vmatpush.msrb.mxu1 %v3966_v18  ;;  %v2681_v14 = vand.u32 4294901760, %v4034_v7  ;;  %v2671_v52 = vand.u32 4294901760, %v2670_v30  ;;  %2613 = vmatpush.msrb.mxu2 %v4066_v29  ;;  %v2717_v30 = vand.u32 4294901760, %v4114_v9 }
 0x70b   : > { %2480 = vmatmul.f32.vlgmr.msra.gmra.mxu3 %v2362_v26  ;;  %v2363_v6 = vsub.f32 %v2361_v27, %v2362_v26  ;;  %v2579_v27 = vld [vmem:[%s3404_s28 + $0x28] sm:$0xff]  ;;  %v2688_v26 = vsub.f32 %v4050_v63, %v2687_v49 }
 0x70c   : > { %v2338_v36 = vsel %vm644_vm1, %v3955_v45, 0  ;;  %2812 = vmatpush.msrb.mxu1 %v3975_v51  ;;  %v2682_v35 = vsub.f32 %v4034_v7, %v2681_v14  ;;  %2672 = vmatpush.msrb.mxu3 %v2671_v52  ;;  %v2574_v52 = vld [vmem:[%s3404_s28] sm:$0xff] }
 0x70d   : > { %v2364_v61 = vand.u32 4294901760, %v2363_v6  ;;  %v2368_v8 = vand.u32 4294901760, %v2338_v36 }
 0x70e   : > { %2814 = vmatpush.msrb.mxu1 %v3988_v15  ;;  %v2683_v4 = vand.u32 4294901760, %v2682_v35  ;;  %2678 = vmatpush.msrb.mxu3 %v2677_v34  ;;  %v2718_v34 = vsub.f32 %v4114_v9, %v2717_v30 }
 0x70f   : > { %2365 = vmatmul.f32.vlgmr.msrb.gmra.mxu0 %v2364_v61  ;;  %2418 = vmatmul.f32.gmra.mxu1 %v2368_v8  ;;  %v2369_v47 = vsub.f32 %v2338_v36, %v2368_v8  ;;  %v4074_v36 = vand.u32 4294901760, %v2579_v27  ;;  %v4079_v61 = vsub.f32 %v2580_v5, %v4066_v29 }
 0x710   : > { %2750 = vmatpush.msrb.mxu0 %v3964_v11  ;;  %2816 = vmatpush.msrb.mxu1 %v4003_v40  ;;  %v3212_v11 = vld [vmem:[%s4283_s26] ss:$0 sm:$0xff] }
 0x711   : > { %2453 = vmatmul.f32.gmra.mxu2 %v2369_v47  ;;  %v2370_v46 = vand.u32 4294901760, %v2369_v47  ;;  %2684 = vmatpush.msrb.mxu3 %v2683_v4  ;;  %v2699_v3 = vand.u32 4294901760, %v4079_v61  ;;  %v4144_v4 = vsub.f32 %v2575_v58, %v4131_v13 }
 0x712   : > { %2753 = vmatpush.msrb.mxu0 %v3973_v0  ;;  %2818 = vmatpush.msrb.mxu1 %v4011_v42 }
 0x713   : > { %2486 = vmatmul.f32.gmra.mxu3 %v2370_v46  ;;  %v2371_v48 = vsub.f32 %v2369_v47, %v2370_v46  ;;  %v2689_v47 = vand.u32 4294901760, %v2688_v26  ;;  %2615 = vmatpush.msrb.mxu2 %v4074_v36  ;;  %v2700_v43 = vsub.f32 %v4079_v61, %v2699_v3  ;;  %v2719_v26 = vand.u32 4294901760, %v2718_v34 }
 0x714   : > { %2756 = vmatpush.msrb.mxu0 %v3986_v56  ;;  %2820 = vmatpush.msrb.mxu1 %v4026_v24 }
 0x715   : > { %v2372_v50 = vand.u32 4294901760, %v2371_v48  ;;  %v4087_v48 = vsub.f32 %v2579_v27, %v4074_v36  ;;  %2690 = vmatpush.msrb.mxu3 %v2689_v47  ;;  %v2701_v57 = vand.u32 4294901760, %v2700_v43  ;;  %v4139_v27 = vand.u32 4294901760, %v2574_v52 }
 0x716   : > { %2759 = vmatpush.msrb.mxu0 %v3999_v39  ;;  %2822 = vmatpush.msrb.mxu1 %v4036_v16 }
 0x717   : > { %2373 = vmatmul.f32.gmra.mxu0 %v2372_v50  ;;  %2548 = vmatmul.f32.vlgmr.msra.gmra.mxu1 %v2360_v33  ;;  %v2705_v59 = vand.u32 4294901760, %v4087_v48  ;;  %v4151_v47 = vsub.f32 %v2574_v52, %v4139_v27 }
 0x718   : > { %2762 = vmatpush.msrb.mxu0 %v4015_v22  ;;  %2824 = vmatpush.msrb.mxu1 %v4052_v31 }
 0x719   : > { %v2706_v41 = vsub.f32 %v4087_v48, %v2705_v59 }
 0x71a   : > { %2765 = vmatpush.msrb.mxu0 %v4024_v60  ;;  %2826 = vmatpush.msrb.mxu1 %v4066_v29 }
 0x71b   : > { %v2707_v62 = vand.u32 4294901760, %v2706_v41 }
 0x71c   : > { %2768 = vmatpush.msrb.mxu0 %v4034_v7  ;;  %2828 = vmatpush.msrb.mxu1 %v4074_v36 }
 0x71e   : > { %2771 = vmatpush.msrb.mxu0 %v4050_v63 }
 0x71f   : > { %2519 = vmatmul.f32.vlgmr.msra.gmra.mxu0 %v2360_v33  ;;  %2552 = vmatmul.f32.gmra.mxu1 %v2368_v8  ;;  %v4063_v33 = vsub.f32 %v2581_v1, %v4052_v31  ;;  %v4127_v1 = vsub.f32 %v2576_v54, %v4116_v53 }
 0x721   : > { %v2693_v6 = vand.u32 4294901760, %v4063_v33  ;;  %2774 = vmatpush.msrb.mxu0 %v4063_v33  ;;  %v2723_v35 = vand.u32 4294901760, %v4127_v1 }
 0x723   : > { %v2694_v46 = vsub.f32 %v4063_v33, %v2693_v6  ;;  %2777 = vmatpush.msrb.mxu0 %v4079_v61 }
 0x725   : > { %v2695_v44 = vand.u32 4294901760, %v2694_v46  ;;  %2780 = vmatpush.msrb.mxu0 %v4087_v48  ;;  %v2729_v46 = vand.u32 4294901760, %v4144_v4 }
 0x727   : > { %2523 = vmatmul.f32.gmra.mxu0 %v2368_v8  ;;  %v2578_v8 = vld [vmem:[%s3404_s28 + $0x20] sm:$0xff]  ;;  %2696 = vmatpush.msrb.mxu3 %v2695_v44  ;;  %v2735_v44 = vand.u32 4294901760, %v4151_v47  ;;  %v2730_v43 = vsub.f32 %v4144_v4, %v2729_v46 }
 0x728   : > { %v4089_v50 = vand.u32 4294901760, %v2578_v8 }
 0x729   : > { %2702 = vmatpush.msrb.mxu3 %v2701_v57  ;;  %v2736_v41 = vsub.f32 %v4151_v47, %v2735_v44  ;;  %v2731_v57 = vand.u32 4294901760, %v2730_v43 }
 0x72a   : > { %v4098_v55 = vsub.f32 %v2578_v8, %v4089_v50  ;;  %2617 = vmatpush.msrb.mxu2 %v4089_v50  ;;  %2830 = vmatpush.msrb.mxu1 %v4089_v50  ;;  %v2724_v8 = vsub.f32 %v4127_v1, %v2723_v35 }
 0x72b   : > { %2708 = vmatpush.msrb.mxu3 %v2707_v62  ;;  %v2737_v58 = vand.u32 4294901760, %v2736_v41 }
 0x72c   : > { %v2711_v37 = vand.u32 4294901760, %v4098_v55  ;;  %2619 = vmatpush.msrb.mxu2 %v4100_v12  ;;  %2783 = vmatpush.msrb.mxu0 %v4098_v55  ;;  %v2725_v17 = vand.u32 4294901760, %v2724_v8 }
 0x72d   : > { %2832 = vmatpush.msrb.mxu1 %v4100_v12 }
 0x72e   : > { %v2712_v19 = vsub.f32 %v4098_v55, %v2711_v37  ;;  %2621 = vmatpush.msrb.mxu2 %v4116_v53  ;;  %2786 = vmatpush.msrb.mxu0 %v4114_v9 }
 0x72f   : > { %2834 = vmatpush.msrb.mxu1 %v4116_v53 }
 0x730   : > { %v2713_v5 = vand.u32 4294901760, %v2712_v19  ;;  %2623 = vmatpush.msrb.mxu2 %v4131_v13  ;;  %2789 = vmatpush.msrb.mxu0 %v4127_v1 }
 0x731   : > { %2836 = vmatpush.msrb.mxu1 %v4131_v13 }
 0x732   : > { %2714 = vmatpush.msrb.mxu3 %v2713_v5  ;;  %2625 = vmatpush.msrb.mxu2 %v4139_v27 }
 0x733   : > { %2792 = vmatpush.msrb.mxu0 %v4144_v4  ;;  %2838 = vmatpush.msrb.mxu1 %v4139_v27 }
 0x734   : > { %2855 = vmatpush.msra.mxu2 %v2645_v25  ;;  %2720 = vmatpush.msrb.mxu3 %v2719_v26 }
 0x735   : > { %2795 = vmatpush.msrb.mxu0 %v4151_v47 }
 0x736   : > { %2859 = vmatpush.msra.mxu2 %v2651_v28  ;;  %2726 = vmatpush.msrb.mxu3 %v2725_v17 }
 0x738   : > { %2863 = vmatpush.msra.mxu2 %v2657_v21  ;;  %2732 = vmatpush.msrb.mxu3 %v2731_v57 }
 0x73a   : > { %2867 = vmatpush.msra.mxu2 %v2663_v2  ;;  %2738 = vmatpush.msrb.mxu3 %v2737_v58 }
 0x73c   : > { %2926 = vmatpush.msra.mxu3 %v3960_v32  ;;  %2871 = vmatpush.msra.mxu2 %v2669_v10 }
 0x73e   : > { %2928 = vmatpush.msra.mxu3 %v3966_v18  ;;  %2875 = vmatpush.msra.mxu2 %v2675_v23 }
 0x740   : > { %2930 = vmatpush.msra.mxu3 %v3975_v51  ;;  %2879 = vmatpush.msra.mxu2 %v2681_v14 }
 0x742   : > { %2932 = vmatpush.msra.mxu3 %v3988_v15  ;;  %2883 = vmatpush.msra.mxu2 %v2687_v49 }
 0x744   : > { %2934 = vmatpush.msra.mxu3 %v4003_v40  ;;  %2887 = vmatpush.msra.mxu2 %v2693_v6 }
 0x746   : > { %2936 = vmatpush.msra.mxu3 %v4011_v42  ;;  %2891 = vmatpush.msra.mxu2 %v2699_v3 }
 0x748   : > { %2938 = vmatpush.msra.mxu3 %v4026_v24  ;;  %2895 = vmatpush.msra.mxu2 %v2705_v59 }
 0x74a   : > { %2940 = vmatpush.msra.mxu3 %v4036_v16  ;;  %2899 = vmatpush.msra.mxu2 %v2711_v37 }
 0x74c   : > { %2942 = vmatpush.msra.mxu3 %v4052_v31  ;;  %2903 = vmatpush.msra.mxu2 %v2717_v30 }
 0x74e   : > { %2944 = vmatpush.msra.mxu3 %v4066_v29  ;;  %2907 = vmatpush.msra.mxu2 %v2723_v35 }
 0x750   : > { %2946 = vmatpush.msra.mxu3 %v4074_v36  ;;  %2911 = vmatpush.msra.mxu2 %v2729_v46  ;;  %v3213_v46 = vld [vmem:[%s618_s0] ss:$0 sm:$0xff] }
 0x752   : > { %2948 = vmatpush.msra.mxu3 %v4089_v50  ;;  %2915 = vmatpush.msra.mxu2 %v2735_v44 }
 0x754   : > { %2950 = vmatpush.msra.mxu3 %v4100_v12 }
 0x756   : > { %2952 = vmatpush.msra.mxu3 %v4116_v53 }
 0x758   : > { %2954 = vmatpush.msra.mxu3 %v4131_v13 }
 0x75a   : > { %2956 = vmatpush.msra.mxu3 %v4139_v27 }
 0x784   : > { %v2415_v54 = vpop.f32.mrf.mxu1 }
 0x78c   : > { %v2366_v25 = vpop.f32.mrf.mxu0  ;;  %v2419_v28 = vpop.f32.mrf.mxu1 }
 0x78d   : > { %v2367_v0 = vadd.f32 %v3212_v11, %v2366_v25  ;;  %v2449_v21 = vpop.f32.mrf.mxu2 }
 0x78e   : > { %v2481_v2 = vpop.f32.mrf.mxu3 }
 0x78f   : > { %v2416_v56 = vadd.f32 %v2415_v54, %v2367_v0 }
 0x791   : > { %v2450_v32 = vadd.f32 %v2449_v21, %v2416_v56 }
 0x793   : > { %v2482_v51 = vadd.f32 %v2481_v2, %v2450_v32 }
 0x794   : > { %v2374_v39 = vpop.f32.mrf.mxu0  ;;  %v2549_v22 = vpop.f32.mrf.mxu1 }
 0x795   : > { %v2375_v18 = vadd.f32 %v3212_v11, %v2374_v39  ;;  %v2454_v10 = vpop.f32.mrf.mxu2 }
 0x796   : > { %v2487_v7 = vpop.f32.mrf.mxu3 }
 0x797   : > { %v2420_v15 = vadd.f32 %v2419_v28, %v2375_v18 }
 0x799   : > { %v2455_v42 = vadd.f32 %v2454_v10, %v2420_v15 }
 0x79b   : > { %v2488_v16 = vadd.f32 %v2487_v7, %v2455_v42 }
 0x79c   : > { %v2520_v40 = vpop.f32.mrf.mxu0  ;;  %v2553_v33 = vpop.f32.mrf.mxu1 }
 0x79d   : > { %v2521_v60 = vadd.f32 %v2520_v40, %v2482_v51 }
 0x79f   : > { %v2550_v24 = vadd.f32 %v2549_v22, %v2521_v60 }
 0x7a1   : > { %v2556_v23 = vmul.f32 %v2550_v24, %v2550_v24 }
 0x7a3   : > { %v2558_v14 = vmul.f32 %v2556_v23, %v2550_v24 }
 0x7a4   : > { %v2524_v63 = vpop.f32.mrf.mxu0 }
 0x7a5   : > { %v2560_v31 = vmul.f32 0.044715, %v2558_v14  ;;  %v2525_v49 = vadd.f32 %v2524_v63, %v2488_v16 }
 0x7a7   : > { %v2562_v29 = vadd.f32 %v2560_v31, %v2550_v24  ;;  %v2554_v6 = vadd.f32 %v2553_v33, %v2525_v49 }
 0x7a9   : > { %v2564_v61 = vmul.f32 0.7978846, %v2562_v29  ;;  %v2557_v48 = vmul.f32 %v2554_v6, %v2554_v6 }
 0x7ab   : > { %3254 = vtanh.f32 %v2564_v61  ;;  %v2559_v36 = vmul.f32 %v2557_v48, %v2554_v6 }
 0x7ad   : > { %v2561_v3 = vmul.f32 0.044715, %v2559_v36 }
 0x7af   : > { %v2563_v50 = vadd.f32 %v2561_v3, %v2554_v6 }
 0x7b1   : > { %v3255_v59 = vpop.eup %3254  ;;  %v2565_v55 = vmul.f32 0.7978846, %v2563_v50 }
 0x7b2   : > { %v2568_v37 = vadd.f32 1.0, %v3255_v59 }
 0x7b3   : > { %3256 = vtanh.f32 %v2565_v55 }
 0x7b4   : > { %v2570_v9 = vmul.f32 0.5, %v2568_v37 }
 0x7b6   : > { %v2572_v12 = vmul.f32 %v2570_v9, %v2550_v24 }
 0x7b8   : > { %v2626_v62 = vand.u32 4294901760, %v2572_v12 }
 0x7b9   : > { %v3257_v19 = vpop.eup %3256 }
 0x7ba   : > { %2740 = vmatmul.f32.vlgmr.msrb.gmra.mxu3 %v2626_v62  ;;  %v2627_v53 = vsub.f32 %v2572_v12, %v2626_v62  ;;  %v2569_v30 = vadd.f32 1.0, %v3257_v19 }
 0x7bc   : > { %2798 = vmatmul.f32.vlgmr.msrb.gmra.mxu0 %v2627_v53  ;;  %v2628_v1 = vand.u32 4294901760, %v2627_v53  ;;  %v2571_v13 = vmul.f32 0.5, %v2569_v30 }
 0x7be   : > { %2842 = vmatmul.f32.vlgmr.msrb.gmra.mxu1 %v2628_v1  ;;  %v2629_v52 = vsub.f32 %v2627_v53, %v2628_v1  ;;  %v2573_v5 = vmul.f32 %v2571_v13, %v2554_v6  ;;  %v3214_v1 = vld [vmem:[%s621_s19] ss:$0 sm:$0xff] }
 0x7c0   : > { %v2630_v34 = vand.u32 4294901760, %v2629_v52  ;;  %v2634_v35 = vand.u32 4294901760, %v2573_v5  ;;  %v3215_v52 = vld [vmem:[%s624_s1] ss:$0 sm:$0xff] }
 0x7c2   : > { %2631 = vmatmul.f32.vlgmr.msrb.gmra.mxu2 %v2630_v34  ;;  %2744 = vmatmul.f32.gmra.mxu3 %v2634_v35  ;;  %v2635_v27 = vsub.f32 %v2573_v5, %v2634_v35 }
 0x7c4   : > { %2803 = vmatmul.f32.gmra.mxu0 %v2635_v27  ;;  %v2636_v4 = vand.u32 4294901760, %v2635_v27 }
 0x7c6   : > { %2848 = vmatmul.f32.gmra.mxu1 %v2636_v4  ;;  %v2637_v26 = vsub.f32 %v2635_v27, %v2636_v4 }
 0x7c8   : > { %v2638_v8 = vand.u32 4294901760, %v2637_v26 }
 0x7ca   : > { %2639 = vmatmul.f32.gmra.mxu2 %v2638_v8  ;;  %2958 = vmatmul.f32.vlgmr.msra.gmra.mxu3 %v2626_v62 }
 0x7d2   : > { %2917 = vmatmul.f32.vlgmr.msra.gmra.mxu2 %v2626_v62  ;;  %2962 = vmatmul.f32.gmra.mxu3 %v2634_v35 }
 0x7da   : > { %2921 = vmatmul.f32.gmra.mxu2 %v2634_v35 }
 0x839   : > { %v2799_v41 = vpop.f32.mrf.mxu0 }
 0x83b   : > { %v2843_v25 = vpop.f32.mrf.mxu1 }
 0x83d   : > { %v2741_v47 = vpop.f32.mrf.mxu3 }
 0x841   : > { %v2804_v32 = vpop.f32.mrf.mxu0 }
 0x843   : > { %v2849_v15 = vpop.f32.mrf.mxu1 }
 0x845   : > { %v2632_v17 = vpop.f32.mrf.mxu2  ;;  %v2745_v43 = vpop.f32.mrf.mxu3 }
 0x846   : > { %v2633_v44 = vadd.f32 %v3213_v46, %v2632_v17 }
 0x848   : > { %v2742_v54 = vadd.f32 %v2741_v47, %v2633_v44 }
 0x84a   : > { %v2800_v11 = vadd.f32 %v2799_v41, %v2742_v54 }
 0x84c   : > { %v2844_v28 = vadd.f32 %v2843_v25, %v2800_v11 }
 0x84d   : > { %v2640_v57 = vpop.f32.mrf.mxu2  ;;  %v2959_v56 = vpop.f32.mrf.mxu3 }
 0x84e   : > { %v2641_v58 = vadd.f32 %v3213_v46, %v2640_v57 }
 0x850   : > { %v2746_v0 = vadd.f32 %v2745_v43, %v2641_v58 }
 0x852   : > { %v2805_v2 = vadd.f32 %v2804_v32, %v2746_v0 }
 0x854   : > { %v2850_v22 = vadd.f32 %v2849_v15, %v2805_v2 }
 0x855   : > { %v2918_v21 = vpop.f32.mrf.mxu2  ;;  %v2963_v42 = vpop.f32.mrf.mxu3 }
 0x856   : > { %v2919_v39 = vadd.f32 %v2918_v21, %v2844_v28 }
 0x858   : > { %v2960_v18 = vadd.f32 %v2959_v56, %v2919_v39 }
 0x85a   : > { %v2966_v51 = vadd.f32 %v2960_v18, %v3950_v38 }
 0x85c   : > { %v2970_v40 = vsel %vm644_vm1, %v2966_v51, 0.0 }
 0x85d   : > { %v2922_v60 = vpop.f32.mrf.mxu2  ;;  %2971 = vadd.xlane.f32.xlu1 %v2970_v40 }
 0x85e   : > { %v2923_v10 = vadd.f32 %v2922_v60, %v2850_v22 }
 0x860   : > { %v2964_v24 = vadd.f32 %v2963_v42, %v2923_v10 }
 0x862   : > { %v2967_v23 = vadd.f32 %v2964_v24, %v3955_v45 }
 0x864   : > { %v2973_v7 = vsel %vm644_vm1, %v2967_v23, 0.0 }
 0x865   : > { %2974 = vadd.xlane.f32.xlu2 %v2973_v7 }
 0x8d0   : > { %v2972_v16 = vpop.xlane.xlu1 %2971 }
 0x8d1   : > { %v2976_v14 = vmul.f32 %v2972_v16, %v3919_v20 }
 0x8d3   : > { %v2978_v63 = vsub.f32 %v2966_v51, %v2976_v14 }
 0x8d5   : > { %v2980_v31 = vmul.f32 %v2978_v63, %v2978_v63 }
 0x8d7   : > { %v2982_v38 = vsel %vm644_vm1, %v2980_v31, 0.0 }
 0x8d8   : > { %2983 = vadd.xlane.f32.xlu0 %v2982_v38  ;;  %v2975_v49 = vpop.xlane.xlu2 %2974 }
 0x8d9   : > { %v2977_v33 = vmul.f32 %v2975_v49, %v3919_v20 }
 0x8db   : > { %v2979_v29 = vsub.f32 %v2967_v23, %v2977_v33 }
 0x8dd   : > { %v2981_v6 = vmul.f32 %v2979_v29, %v2979_v29 }
 0x8df   : > { %v2985_v61 = vsel %vm644_vm1, %v2981_v6, 0.0 }
 0x8e0   : > { %2986 = vadd.xlane.f32.xlu1 %v2985_v61 }
 0x94b   : > { %v2984_v45 = vpop.xlane.xlu0 %2983 }
 0x94c   : > { %v2988_v48 = vmul.f32 %v2984_v45, %v3919_v20 }
 0x94e   : > { %v2990_v36 = vadd.f32 1e-12, %v2988_v48 }
 0x950   : > { %3258 = vrsqrt.f32 %v2990_v36  ;;  %vm2998_vm14 = vweird.f32 %v2990_v36 }
 0x953   : > { %v2987_v3 = vpop.xlane.xlu1 %2986 }
 0x954   : > { %v2989_v50 = vmul.f32 %v2987_v3, %v3919_v20 }
 0x956   : > { %v3259_v59 = vpop.eup %3258  ;;  %v2991_v55 = vadd.f32 1e-12, %v2989_v50 }
 0x957   : > { %v2993_v37 = vmul.f32 %v3259_v59, %v2990_v36  ;;  %vm2999_vm13 = vweird.f32 %v3259_v59 }
 0x958   : > { %3260 = vrsqrt.f32 %v2991_v55  ;;  %vm3000_vm15 = vmor %vm2998_vm14, %vm2999_vm13  ;;  %vm3008_vm2 = vweird.f32 %v2991_v55 }
 0x959   : > { %v2994_v9 = vmul.f32 %v3259_v59, %v2993_v37 }
 0x95b   : > { %v2995_v12 = vmul.f32 0.5, %v2994_v9 }
 0x95d   : > { %v2996_v62 = vsub.f32 1.5, %v2995_v12 }
 0x95e   : > { %v3261_v19 = vpop.eup %3260 }
 0x95f   : > { %v2997_v53 = vmul.f32 %v3259_v59, %v2996_v62  ;;  %v3003_v30 = vmul.f32 %v3261_v19, %v2991_v55  ;;  %vm3009_vm0 = vweird.f32 %v3261_v19 }
 0x960   : > { %vm3010_vm3 = vmor %vm3008_vm2, %vm3009_vm0 }
 0x961   : > { %v3001_v20 = vsel %vm3000_vm15, %v3259_v59, %v2997_v53  ;;  %v3004_v13 = vmul.f32 %v3261_v19, %v3003_v30 }
 0x962   : > { %v3012_v5 = vmul.f32 %v3001_v20, %v2978_v63 }
 0x963   : > { %v3005_v34 = vmul.f32 0.5, %v3004_v13 }
 0x964   : > { %v3017_v35 = vmul.f32 %v3214_v1, %v3012_v5 }
 0x965   : > { %v3006_v27 = vsub.f32 1.5, %v3005_v34 }
 0x966   : > { %v3022_v4 = vadd.f32 %v3215_v52, %v3017_v35 }
 0x967   : > { %v3007_v26 = vmul.f32 %v3261_v19, %v3006_v27 }
 0x968   : > { %3024 = vst.msk [vmem:[#allocation2] sm:$0xff] %vm644_vm1, %v3022_v4 }
 0x969   : > { %3026 = vst.msk [vmem:[%s4284_s21] sm:$0xff] %vm644_vm1, %v3022_v4  ;;  %v3011_v8 = vsel %vm3010_vm3, %v3261_v19, %v3007_v26 }
 0x96a   : > { %v3013_v47 = vmul.f32 %v3011_v8, %v2979_v29 }
 0x96c   : > { %v3018_v46 = vmul.f32 %v3214_v1, %v3013_v47 }
 0x96e   : > { %v3023_v17 = vadd.f32 %v3215_v52, %v3018_v46 }
 0x970   : > { %3025 = vst.msk [vmem:[#allocation2 + $0x8] sm:$0xff] %vm644_vm1, %v3023_v17 }
 0x971   : > { %3027 = vst.msk [vmem:[%s4284_s21 + $0x8] sm:$0xff] %vm644_vm1, %v3023_v17 }
 0x972 PF: > { %s4285_s29 = sld [smem:[#allocation3_spill]] }
 0x978   : > { %s24_s29 = sadd.s32 1, %s4285_s29  }
 0x979   : > { %p21_p5 = scmp.ge.s32.totalorder %s24_s29, 6  }
 0x97b   :  { %23 = sbr.rel (!%p21_p5) target bundleno = 6 (0x6), region = 139 }

</bundles_post_ra>
